<compile_context>
chip_gen: v6e
topology: v6e:2x2x1
jax: 0.10.0
libtpu: 0.0.40
codegen_flags: <defaults>
</compile_context>

<pallas_src>
import functools

import jax
import jax.numpy as jnp
from jax.experimental import pallas as pl
from jax.experimental.pallas import tpu as pltpu


def _denoise_kernel(x_ref, dw_ref, bd_ref, o_ref, *, H, W, C, k, scale, wt):
    # x_ref : (bt*H, W*C)   bt images fused on sublanes, (W, C) fused on lanes.
    # dw_ref: (k*k, W*C)    depthwise taps pre-tiled over W, dx border zeroed.
    # bd_ref: (wt*C, wt*C)  block-diagonal Wpw^T (wt copies on the diagonal).
    # o_ref : (bt*H, W*C)
    rows, WC = x_ref.shape
    pad = k // 2

    x = x_ref[...].astype(jnp.float32)
    dw_all = dw_ref[...].astype(jnp.float32)          # load all taps once

    # Row index within each image (row rolls wrap across image boundaries; the
    # validity mask zeroes exactly those rows -> implicit H-direction padding).
    hrow = jax.lax.broadcasted_iota(jnp.int32, (rows, 1), 0) % H

    # ---------------- depthwise k x k convolution (XLU shifts + VALU MAC) ----
    acc = jnp.zeros((rows, WC), jnp.float32)
    for dy in range(k):
        if dy == pad:
            xr = x
        else:
            xr = pltpu.roll(x, shift=(pad - dy) % rows, axis=0)           # XLU
            valid = (hrow >= pad - dy) & (hrow < H + pad - dy)
            xr = jnp.where(valid, xr, 0.0)
        for dx in range(k):
            t = dy * k + dx
            if dx == pad:
                xs = xr
            else:
                xs = pltpu.roll(xr, shift=((pad - dx) * C) % WC, axis=1)  # XLU
            acc = acc + xs * dw_all[t:t + 1, :]                           # VALU

    # -------- pointwise 1x1 on the MXU via block-diagonal Wpw^T --------------
    # pw[r, w*C + o] = sum_c acc[r, w*C + c] * Wpw[o, c]
    bd = bd_ref[...].astype(jnp.float32)
    group = wt * C
    n_slices = W // wt
    for g in range(n_slices):
        sl = slice(g * group, (g + 1) * group)        # 128-lane aligned slices
        pw = jnp.dot(acc[:, sl], bd, preferred_element_type=jnp.float32)  # MXU
        # SiLU: exp and approximate reciprocal both land on the EUP slot.
        sig = pl.reciprocal(1.0 + jnp.exp(-pw), approx=True)
        o_ref[:, sl] = (x[:, sl] + jnp.float32(scale) * pw * sig
                        ).astype(o_ref.dtype)


def _vmem_budget_bytes():
    """~75% of this generation's physical VMEM (48 MiB v7x, 96 MiB v5e/v6e)."""
    cap = 64 * 1024 * 1024            # conservative default = v7x physical
    try:
        cap = int(getattr(pltpu.get_tpu_info(), "vmem_capacity_bytes", cap))
    except Exception:
        cap = 64 * 1024 * 1024
    return int(cap * 0.75)


def _choose_pw_group(W, C):
    """Columns per block-diagonal group: largest Wt | W with Wt*C <= 1024 lanes
    and 128-lane alignment (so lane slices / stores stay unmasked)."""
    if W * C <= 1024:
        return W
    best = None
    for wt in range(1, W + 1):
        if W % wt:
            continue
        g = wt * C
        if g % 128 == 0 and g <= 1024:
            best = wt
    if best is None:
        best = W  # TODO(synk): C not 128-alignable -> pad C or (rows*W, C) path
    return best


def _choose_images_per_step(B, H, WC, act_itemsize, weight_bytes, vmem_budget):
    """Largest image block that fits the VMEM budget.  Only prefer >= 2 grid
    steps (v7x has 2 TensorCores) when each block still has >= 256 rows, so
    single-TC chips (v5e/v6e) are not charged per-step overhead for tiny tiles.
    """
    def block_bytes(bt):
        act = bt * H * WC
        # double-buffered in + out at activation dtype, ~6 live f32 temporaries
        return act * (4 * act_itemsize + 6 * 4) + 2 * weight_bytes

    cands = [bt for bt in range(1, B + 1)
             if B % bt == 0
             and ((bt * H) % 8 == 0 or bt == B)        # (8, 128) block tiling
             and block_bytes(bt) <= vmem_budget]
    if not cands:
        return 1  # TODO(synk): H-tiling with +/-pad-row halo for huge images
    big_multi = [bt for bt in cands if B // bt >= 2 and bt * H >= 256]
    return max(big_multi) if big_multi else max(cands)


def depthwise_denoising_block_nhwc(x_nhwc, w_dw, w_pw, *, scale=0.1):
    """NHWC-native forward (preferred entry point: no layout transposes).

    x_nhwc: (B, H, W, C); w_dw: (C, 1, k, k); w_pw: (C, C, 1, 1).
    """
    B, H, W, C = x_nhwc.shape
    k = w_dw.shape[-1]
    pad = k // 2
    WC = W * C

    # --- depthwise taps pre-tiled over W, with the dx border columns zeroed
    #     (W-direction zero padding folded into the weights) ---
    taps = jnp.transpose(w_dw[:, 0].astype(jnp.float32), (1, 2, 0))       # (k,k,C)
    w_idx = jnp.arange(W)
    dx_idx = jnp.arange(k)
    valid_w = ((w_idx[None, :] + dx_idx[:, None] - pad >= 0) &
               (w_idx[None, :] + dx_idx[:, None] - pad < W)
               ).astype(jnp.float32)                                      # (k, W)
    dw_taps = (taps.reshape(k, k, 1, C) *
               valid_w.reshape(1, k, W, 1)).reshape(k * k, WC)

    # --- block-diagonal pointwise weight for the MXU path:
    #     bd[wl*C + c, wl*C + o] = Wpw[o, c] ---
    wt = _choose_pw_group(W, C)
    wpw2 = w_pw[:, :, 0, 0].astype(jnp.float32)                           # (O, C)
    bd = jnp.kron(jnp.eye(wt, dtype=jnp.float32), wpw2.T)                 # (wt*C, wt*C)

    # --- lane-dense 2-D view: rows on sublanes, (W, C) fused on lanes ---
    x2 = x_nhwc.reshape(B * H, WC)          # contiguous row-major fuse: free

    vmem_budget = _vmem_budget_bytes()
    weight_bytes = (k * k * WC + (wt * C) ** 2) * 4
    bt = _choose_images_per_step(B, H, WC, x2.dtype.itemsize,
                                 weight_bytes, vmem_budget)
    grid = (B // bt,)
    rows = bt * H

    kernel = functools.partial(_denoise_kernel,
                               H=H, W=W, C=C, k=k, scale=scale, wt=wt)
    out2 = pl.pallas_call(
        kernel,
        out_shape=jax.ShapeDtypeStruct((B * H, WC), x_nhwc.dtype),
        grid_spec=pltpu.PrefetchScalarGridSpec(
            num_scalar_prefetch=0,
            grid=grid,
            in_specs=[
                pl.BlockSpec((rows, WC), lambda i: (i, 0)),
                pl.BlockSpec((k * k, WC), lambda i: (0, 0)),
                pl.BlockSpec((wt * C, wt * C), lambda i: (0, 0)),
            ],
            out_specs=pl.BlockSpec((rows, WC), lambda i: (i, 0)),
        ),
        compiler_params=pltpu.CompilerParams(
            dimension_semantics=("parallel",),
            vmem_limit_bytes=vmem_budget,
        ),
    )(x2, dw_taps, bd)

    return out2.reshape(B, H, W, C)


def depthwise_denoising_block(x_nchw, w_dw, w_pw, *, scale=0.1):
    """PyTorch-layout (NCHW) adapter.  Prefer `depthwise_denoising_block_nhwc`
    to avoid the two layout transposes around the (single-pass) kernel."""
    x_nhwc = jnp.transpose(x_nchw, (0, 2, 3, 1))
    y = depthwise_denoising_block_nhwc(x_nhwc, w_dw, w_pw, scale=scale)
    return jnp.transpose(y, (0, 3, 1, 2))


def _reference(x_nchw, w_dw, w_pw, scale):
    """Pure-JAX reference reproducing the PyTorch semantics (NCHW)."""
    B, C, H, W = x_nchw.shape
    k = w_dw.shape[-1]
    pad = k // 2
    xp = jnp.pad(x_nchw, ((0, 0), (0, 0), (pad, pad), (pad, pad)))
    dw = jnp.zeros((B, C, H, W), jnp.float32)
    for dy in range(k):
        for dx in range(k):
            dw = dw + xp[:, :, dy:dy + H, dx:dx + W] * \
                w_dw[None, :, 0, dy, dx][..., None, None]
    pw = jnp.einsum('oc,bchw->bohw', w_pw[:, :, 0, 0], dw)
    act = pw * jax.nn.sigmoid(pw)
    return x_nchw + scale * act


if __name__ == "__main__":
    B, C, H, W = 2, 32, 16, 16
    KSIZE, SCALE = 3, 0.1

    key = jax.random.PRNGKey(0)
    kx, kd, kp = jax.random.split(key, 3)
    x = jax.random.normal(kx, (B, C, H, W), jnp.float32)
    # deterministic synthetic parameters (same shapes as the nn.Conv2d weights)
    w_dw = jax.random.normal(kd, (C, 1, KSIZE, KSIZE), jnp.float32) * 0.1
    w_pw = jax.random.normal(kp, (C, C, 1, 1), jnp.float32) * 0.1

    fwd = jax.jit(lambda a, d, p: depthwise_denoising_block(a, d, p, scale=SCALE))
    out = jax.block_until_ready(fwd(x, w_dw, w_pw))

    ref = _reference(x, w_dw, w_pw, SCALE)
    assert out.shape == (B, C, H, W)
    assert jnp.allclose(out, ref, atol=2e-4, rtol=2e-4)

    print("KERNEL_OK")
</pallas_src>

<mosaic_0001>
module attributes {stable_mosaic.version = 11 : i64} {
  func.func @_denoise_kernel(%arg0: i32, %arg1: memref<32x512xf32, #tpu.memory_space<vmem>>, %arg2: memref<9x512xf32, #tpu.memory_space<vmem>>, %arg3: memref<512x512xf32, #tpu.memory_space<vmem>>, %arg4: memref<32x512xf32, #tpu.memory_space<vmem>>) attributes {dimension_semantics = [#tpu.dimension_semantics<parallel>], iteration_bounds = array<i64: 1>, scalar_prefetch = 0 : i64, scratch_operands = 0 : i64, tpu.core_type = #tpu.core_type<tc>, window_params = [{transform_indices = @transform_0, window_bounds = array<i64: 32, 512>}, {pipeline_mode = #tpu.pipeline_mode<synchronous>, transform_indices = @transform_1, window_bounds = array<i64: 9, 512>}, {pipeline_mode = #tpu.pipeline_mode<synchronous>, transform_indices = @transform_2, window_bounds = array<i64: 512, 512>}, {transform_indices = @transform_3, window_bounds = array<i64: 32, 512>}]} {
    %c0 = arith.constant 0 : index
    %c0_0 = arith.constant 0 : index
    %0 = vector.load %arg1[%c0, %c0_0] : memref<32x512xf32, #tpu.memory_space<vmem>>, vector<32x512xf32>
    %c0_1 = arith.constant 0 : index
    %c0_2 = arith.constant 0 : index
    %1 = vector.load %arg2[%c0_1, %c0_2] : memref<9x512xf32, #tpu.memory_space<vmem>>, vector<9x512xf32>
    %2 = tpu.iota {dimensions = array<i32: 0>} : vector<32x1xi32>
    %c16_i32 = arith.constant 16 : i32
    %c0_i32 = arith.constant 0 : i32
    %3 = arith.cmpi eq, %c16_i32, %c0_i32 : i32
    %c1_i32 = arith.constant 1 : i32
    %4 = arith.select %3, %c1_i32, %c16_i32 : i32
    %5 = vector.broadcast %4 : i32 to vector<32x1xi32>
    %6 = arith.remsi %2, %5 : vector<32x1xi32>
    %c0_i32_3 = arith.constant 0 : i32
    %7 = vector.broadcast %c0_i32_3 : i32 to vector<32x1xi32>
    %8 = arith.cmpi ne, %6, %7 : vector<32x1xi32>
    %c0_i32_4 = arith.constant 0 : i32
    %9 = vector.broadcast %c0_i32_4 : i32 to vector<32x1xi32>
    %10 = arith.cmpi slt, %6, %9 : vector<32x1xi32>
    %c0_i32_5 = arith.constant 0 : i32
    %11 = arith.cmpi slt, %4, %c0_i32_5 : i32
    %12 = vector.broadcast %11 : i1 to vector<32x1xi1>
    %13 = vector.broadcast %12 : vector<32x1xi1> to vector<32x1xi1>
    %14 = arith.xori %10, %13 : vector<32x1xi1>
    %15 = arith.andi %14, %8 : vector<32x1xi1>
    %16 = vector.broadcast %4 : i32 to vector<32x1xi32>
    %17 = arith.addi %6, %16 : vector<32x1xi32>
    %18 = arith.select %15, %17, %6 : vector<32x1xi1>, vector<32x1xi32>
    %cst = arith.constant 0.000000e+00 : f32
    %19 = vector.broadcast %cst : f32 to vector<32x512xf32>
    %c1_i32_6 = arith.constant 1 : i32
    %20 = tpu.dynamic_rotate %0 by %c1_i32_6 dim 0 : vector<32x512xf32>, i32 -> vector<32x512xf32>
    %c1_i32_7 = arith.constant 1 : i32
    %21 = vector.broadcast %c1_i32_7 : i32 to vector<32x1xi32>
    %22 = arith.cmpi sge, %18, %21 : vector<32x1xi32>
    %c17_i32 = arith.constant 17 : i32
    %23 = vector.broadcast %c17_i32 : i32 to vector<32x1xi32>
    %24 = arith.cmpi slt, %18, %23 : vector<32x1xi32>
    %25 = arith.andi %22, %24 : vector<32x1xi1>
    %cst_8 = arith.constant 0.000000e+00 : f32
    %26 = vector.shape_cast %25 : vector<32x1xi1> to vector<32x1xi1>
    %27 = vector.broadcast %26 : vector<32x1xi1> to vector<32x512xi1>
    %28 = vector.broadcast %cst_8 : f32 to vector<32x512xf32>
    %29 = arith.select %27, %20, %28 : vector<32x512xi1>, vector<32x512xf32>
    %c32_i32 = arith.constant 32 : i32
    %30 = tpu.dynamic_rotate %29 by %c32_i32 dim 1 : vector<32x512xf32>, i32 -> vector<32x512xf32>
    %31 = vector.extract_strided_slice %1 {offsets = [0, 0], sizes = [1, 512], strides = [1, 1]} : vector<9x512xf32> to vector<1x512xf32>
    %32 = vector.broadcast %31 : vector<1x512xf32> to vector<32x512xf32>
    %33 = arith.mulf %30, %32 : vector<32x512xf32>
    %34 = arith.addf %19, %33 : vector<32x512xf32>
    %35 = vector.extract_strided_slice %1 {offsets = [1, 0], sizes = [1, 512], strides = [1, 1]} : vector<9x512xf32> to vector<1x512xf32>
    %36 = vector.broadcast %35 : vector<1x512xf32> to vector<32x512xf32>
    %37 = arith.mulf %29, %36 : vector<32x512xf32>
    %38 = arith.addf %34, %37 : vector<32x512xf32>
    %c480_i32 = arith.constant 480 : i32
    %39 = tpu.dynamic_rotate %29 by %c480_i32 dim 1 : vector<32x512xf32>, i32 -> vector<32x512xf32>
    %40 = vector.extract_strided_slice %1 {offsets = [2, 0], sizes = [1, 512], strides = [1, 1]} : vector<9x512xf32> to vector<1x512xf32>
    %41 = vector.broadcast %40 : vector<1x512xf32> to vector<32x512xf32>
    %42 = arith.mulf %39, %41 : vector<32x512xf32>
    %43 = arith.addf %38, %42 : vector<32x512xf32>
    %c32_i32_9 = arith.constant 32 : i32
    %44 = tpu.dynamic_rotate %0 by %c32_i32_9 dim 1 : vector<32x512xf32>, i32 -> vector<32x512xf32>
    %45 = vector.extract_strided_slice %1 {offsets = [3, 0], sizes = [1, 512], strides = [1, 1]} : vector<9x512xf32> to vector<1x512xf32>
    %46 = vector.broadcast %45 : vector<1x512xf32> to vector<32x512xf32>
    %47 = arith.mulf %44, %46 : vector<32x512xf32>
    %48 = arith.addf %43, %47 : vector<32x512xf32>
    %49 = vector.extract_strided_slice %1 {offsets = [4, 0], sizes = [1, 512], strides = [1, 1]} : vector<9x512xf32> to vector<1x512xf32>
    %50 = vector.broadcast %49 : vector<1x512xf32> to vector<32x512xf32>
    %51 = arith.mulf %0, %50 : vector<32x512xf32>
    %52 = arith.addf %48, %51 : vector<32x512xf32>
    %c480_i32_10 = arith.constant 480 : i32
    %53 = tpu.dynamic_rotate %0 by %c480_i32_10 dim 1 : vector<32x512xf32>, i32 -> vector<32x512xf32>
    %54 = vector.extract_strided_slice %1 {offsets = [5, 0], sizes = [1, 512], strides = [1, 1]} : vector<9x512xf32> to vector<1x512xf32>
    %55 = vector.broadcast %54 : vector<1x512xf32> to vector<32x512xf32>
    %56 = arith.mulf %53, %55 : vector<32x512xf32>
    %57 = arith.addf %52, %56 : vector<32x512xf32>
    %c31_i32 = arith.constant 31 : i32
    %58 = tpu.dynamic_rotate %0 by %c31_i32 dim 0 : vector<32x512xf32>, i32 -> vector<32x512xf32>
    %c-1_i32 = arith.constant -1 : i32
    %59 = vector.broadcast %c-1_i32 : i32 to vector<32x1xi32>
    %60 = arith.cmpi sge, %18, %59 : vector<32x1xi32>
    %c15_i32 = arith.constant 15 : i32
    %61 = vector.broadcast %c15_i32 : i32 to vector<32x1xi32>
    %62 = arith.cmpi slt, %18, %61 : vector<32x1xi32>
    %63 = arith.andi %60, %62 : vector<32x1xi1>
    %cst_11 = arith.constant 0.000000e+00 : f32
    %64 = vector.shape_cast %63 : vector<32x1xi1> to vector<32x1xi1>
    %65 = vector.broadcast %64 : vector<32x1xi1> to vector<32x512xi1>
    %66 = vector.broadcast %cst_11 : f32 to vector<32x512xf32>
    %67 = arith.select %65, %58, %66 : vector<32x512xi1>, vector<32x512xf32>
    %c32_i32_12 = arith.constant 32 : i32
    %68 = tpu.dynamic_rotate %67 by %c32_i32_12 dim 1 : vector<32x512xf32>, i32 -> vector<32x512xf32>
    %69 = vector.extract_strided_slice %1 {offsets = [6, 0], sizes = [1, 512], strides = [1, 1]} : vector<9x512xf32> to vector<1x512xf32>
    %70 = vector.broadcast %69 : vector<1x512xf32> to vector<32x512xf32>
    %71 = arith.mulf %68, %70 : vector<32x512xf32>
    %72 = arith.addf %57, %71 : vector<32x512xf32>
    %73 = vector.extract_strided_slice %1 {offsets = [7, 0], sizes = [1, 512], strides = [1, 1]} : vector<9x512xf32> to vector<1x512xf32>
    %74 = vector.broadcast %73 : vector<1x512xf32> to vector<32x512xf32>
    %75 = arith.mulf %67, %74 : vector<32x512xf32>
    %76 = arith.addf %72, %75 : vector<32x512xf32>
    %c480_i32_13 = arith.constant 480 : i32
    %77 = tpu.dynamic_rotate %67 by %c480_i32_13 dim 1 : vector<32x512xf32>, i32 -> vector<32x512xf32>
    %78 = vector.extract_strided_slice %1 {offsets = [8, 0], sizes = [1, 512], strides = [1, 1]} : vector<9x512xf32> to vector<1x512xf32>
    %79 = vector.broadcast %78 : vector<1x512xf32> to vector<32x512xf32>
    %80 = arith.mulf %77, %79 : vector<32x512xf32>
    %81 = arith.addf %76, %80 : vector<32x512xf32>
    %c0_14 = arith.constant 0 : index
    %c0_15 = arith.constant 0 : index
    %82 = vector.load %arg3[%c0_14, %c0_15] : memref<512x512xf32, #tpu.memory_space<vmem>>, vector<512x512xf32>
    %cst_16 = arith.constant dense<0.000000e+00> : vector<32x512xf32>
    %83 = tpu.matmul %81, %82, %cst_16 {dimension_numbers = #tpu.dot_dimension_numbers<[1], [0], [0], [1], [0, 0, 1, 1], [], []>} : vector<32x512xf32>, vector<512x512xf32>, vector<32x512xf32> -> vector<32x512xf32>
    %cst_17 = arith.constant 0.000000e+00 : f32
    %84 = vector.broadcast %cst_17 : f32 to vector<32x512xf32>
    %85 = arith.subf %84, %83 : vector<32x512xf32>
    %86 = math.exp %85 : vector<32x512xf32>
    %cst_18 = arith.constant 1.000000e+00 : f32
    %87 = vector.broadcast %cst_18 : f32 to vector<32x512xf32>
    %88 = arith.addf %87, %86 : vector<32x512xf32>
    %89 = tpu.reciprocal %88 {approx = true} : vector<32x512xf32> -> vector<32x512xf32>
    %cst_19 = arith.constant 1.000000e-01 : f32
    %90 = vector.broadcast %cst_19 : f32 to vector<32x512xf32>
    %91 = arith.mulf %90, %83 : vector<32x512xf32>
    %92 = arith.mulf %91, %89 : vector<32x512xf32>
    %93 = arith.addf %0, %92 : vector<32x512xf32>
    %c0_20 = arith.constant 0 : index
    %c0_21 = arith.constant 0 : index
    %94 = vector.load %arg4[%c0_20, %c0_21] : memref<32x512xf32, #tpu.memory_space<vmem>>, vector<32x512xf32>
    tpu.vector_store %arg4[%c0_20, %c0_21], %93 {strides = array<i32>} : memref<32x512xf32, #tpu.memory_space<vmem>>, vector<32x512xf32>,
    return
  }
  func.func @transform_0(%arg0: i32) -> (i32, i32) {
    %c0_i32 = arith.constant 0 : i32
    %c0_i32_0 = arith.constant 0 : i32
    return %arg0, %c0_i32 : i32, i32
  }
  func.func @transform_1(%arg0: i32) -> (i32, i32) {
    %c0_i32 = arith.constant 0 : i32
    %c0_i32_0 = arith.constant 0 : i32
    %c0_i32_1 = arith.constant 0 : i32
    return %c0_i32, %c0_i32_0 : i32, i32
  }
  func.func @transform_2(%arg0: i32) -> (i32, i32) {
    %c0_i32 = arith.constant 0 : i32
    %c0_i32_0 = arith.constant 0 : i32
    %c0_i32_1 = arith.constant 0 : i32
    return %c0_i32, %c0_i32_0 : i32, i32
  }
  func.func @transform_3(%arg0: i32) -> (i32, i32) {
    %c0_i32 = arith.constant 0 : i32
    %c0_i32_0 = arith.constant 0 : i32
    return %arg0, %c0_i32 : i32, i32
  }
}

</mosaic_0001>

<bundles_post_ra>
// kernel: _lambda_.1
= control target key start
LH: loop header
LB: loop body
LE: loop exit
PB: predicated region body
PF: predicated region fallthrough
CT: control target
= control target key end

     0   :  { %v4188_v0 = vlaneseq  ;;  %s1814_s15 = smov 32   ;;  %s1815_s22 = smov 96   ;;  %s4184_s0 = inlined_call_operand.vmem [shape: f32[32,512], index: 0, kind: input, shape index: {}]   ;;  %s4185_s1 = inlined_call_operand.vmem [shape: f32[9,512], index: 1, kind: input, shape index: {}]   ;;  %s4186_s2 = inlined_call_operand.vmem [shape: f32[512,512], index: 2, kind: input, shape index: {}]   ;;  %s4187_s3 = inlined_call_operand.vmem [shape: f32[32,512], index: 3, kind: output, shape index: {}]  }
   0x1   :  { %v1839_v1 = vld [vmem:[%s4184_s0 + $0x10] sm:$0xff]  ;;  %v1859_v7 = vld [vmem:[%s4184_s0] sm:$0xff]  ;;  %v1876_v12 = vld [vmem:[%s4184_s0 + $0x18] sm:$0xff] }
   0x2   :  { %v1844_v2 = vld [vmem:[%s4184_s0 + $0x70] sm:$0xff]  ;;  %v1852_v4 = vshrl.u32 %v4188_v0, 7  ;;  %v93_v5 = vrot.slane %v1839_v1, 7  ;;  %v1864_v8 = vld [vmem:[%s4184_s0 + $0x60] sm:$0xff]  ;;  %v91_v10 = vrot.slane %v1859_v7, 7  ;;  %v1881_v13 = vld [vmem:[%s4184_s0 + $0x78] sm:$0xff] }
   0x3   :  { %v1849_v3 = vld [vmem:[%s4185_s1 + $0x10] sm:$0xff]  ;;  %v4202_v6 = vrot.slane %v1844_v2, 7  ;;  %v1869_v9 = vld [vmem:[%s4185_s1] sm:$0xff]  ;;  %v103_v11 = vrot.slane %v1864_v8, 7  ;;  %v1889_v16 = vld [vmem:[%s4185_s1 + $0x18] sm:$0xff]  ;;  %v94_v20 = vrot.slane %v1876_v12, 7 }
   0x4   :  { %v47_v14 = vand.u32 15, %v1852_v4  ;;  %vm107_vm0 = vcmp.lt.s32.totalorder %v1852_v4, 1  ;;  %v261_v15 = vsub.s32 1, %v1852_v4  ;;  %v1894_v17 = vld [vmem:[%s4184_s0 + $0x8] sm:$0xff]  ;;  %v4191_v22 = vrot.slane %v1859_v7, 1  ;;  %v1951_v33 = vld [vmem:[%s4184_s0 + $0x20] sm:$0xff] }
   0x5   :  { %v122_v18 = vsel %vm107_vm0, %v4202_v6, %v93_v5  ;;  %v120_v19 = vsel %vm107_vm0, %v103_v11, %v91_v10  ;;  %v1912_v21 = vld [vmem:[%s4184_s0 + $0x68] sm:$0xff]  ;;  %v106_v26 = vrot.slane %v1881_v13, 7  ;;  %v92_v32 = vrot.slane %v1894_v17, 7  ;;  %v1956_v34 = vld [vmem:[%s4184_s0 + $0x38] sm:$0xff]  ;;  %v1980_v39 = vld [vmem:[%s4184_s0 + $0x30] sm:$0xff] }
   0x6   :  { %vm1915_vm1 = vcmp.ge.s32.totalorder %v47_v14, 1  ;;  %v1920_v24 = vrot.slane %v1849_v3, %v261_v15  ;;  %v1923_v25 = vrot.slane %v1869_v9, %v261_v15  ;;  %v1929_v27 = vld [vmem:[%s4185_s1 + $0x8] sm:$0xff]  ;;  %v1945_v31 = vrot.slane %v1889_v16, %v261_v15  ;;  %v1013_v46 = vld [vmem:[%s4186_s2 + $0x1e0] sm:$0xff] }
   0x7   :  { %v1934_v28 = vld [vmem:[%s4184_s0 + $0x28] sm:$0xff]  ;;  %v1938_v29 = vsel %vm1915_vm1, %v122_v18, 0.0  ;;  %v1942_v30 = vsel %vm1915_vm1, %v120_v19, 0.0  ;;  %v123_v37 = vsel %vm107_vm0, %v106_v26, %v94_v20  ;;  %v104_v38 = vrot.slane %v1912_v21, 7  ;;  %v1141_v47 = vld [vmem:[%s4186_s2 + $0x5e0] sm:$0xff] }
   0x8   :  { %4261 = vst [vmem:[#allocation2_spill] sm:$0xff] %v1920_v24  ;;  %4262 = vst [vmem:[#allocation3_spill] sm:$0xff] %v1923_v25  ;;  %176 = vrot.lane.b32.xlu1 %v1938_v29, %s1814_s15  ;;  %v1962_v35 = vmul.f32 %v1920_v24, %v1938_v29  ;;  %160 = vrot.lane.b32.xlu0 %v1942_v30, %s1814_s15  ;;  %v1968_v36 = vmul.f32 %v1923_v25, %v1942_v30  ;;  %v1014_v40 = vld [vmem:[%s4186_s2 + $0x1e8] sm:$0xff]  ;;  %v1987_v41 = vsel %vm1915_vm1, %v123_v37, 0.0  ;;  %v1009_v53 = vld [vmem:[%s4186_s2 + $0x1c0] sm:$0xff] }
   0x9   :  { %4263 = vst [vmem:[#allocation4_spill] sm:$0xff] %v1945_v31  ;;  %v1990_v42 = vrot.slane %v1929_v27, %v261_v15  ;;  %v4192_v43 = vrot.slane %v1894_v17, 1  ;;  %v4200_v44 = vrot.slane %v1934_v28, 1  ;;  %1209 = vmatprep.subr.mxu0 %v1014_v40  ;;  %v1142_v45 = vld [vmem:[%s4186_s2 + $0x5e8] sm:$0xff]  ;;  %v2005_v48 = vmul.f32 %v1945_v31, %v1987_v41  ;;  %v1137_v58 = vld [vmem:[%s4186_s2 + $0x5c0] sm:$0xff] }
   0xa   :  { %v121_v49 = vsel %vm107_vm0, %v104_v38, %v92_v32  ;;  %vm660_vm2 = vcmp.lt.s32.totalorder %v1852_v4, 7  ;;  %v811_v50 = vsub.s32 7, %v1852_v4  ;;  %1298 = vmatprep.subr.mxu1 %v1142_v45  ;;  %1210 = vmatpush1.msra.mxu0 %v1013_v46  ;;  %v1010_v51 = vld [vmem:[%s4186_s2 + $0x1c8] sm:$0xff]  ;;  %v4199_v56 = vrot.slane %v1951_v33, 1  ;;  %v2118_v0 = vld [vmem:[%s4184_s0 + $0x40] sm:$0xff] }
   0xb   :  { %4264 = vst [vmem:[#allocation5_spill] sm:$0xff] %v1990_v42  ;;  %v1138_v52 = vld [vmem:[%s4186_s2 + $0x5c8] sm:$0xff]  ;;  %v145_v54 = vsel %vm1915_vm1, %v121_v49, 0.0  ;;  %v2032_v55 = vsel %vm660_vm2, %v4192_v43, %v4200_v44  ;;  %v4189_v57 = vrot.slane %v1876_v12, 1  ;;  %1299 = vmatpush1.msra.mxu1 %v1141_v47  ;;  %1211 = vmatprep.subr.mxu0 %v1010_v51  ;;  %v4194_v62 = vrot.slane %v1956_v34, 1  ;;  %v1005_v49 = vld [vmem:[%s4186_s2 + $0x1a0] sm:$0xff] }
   0xc   :  { %184 = vrot.lane.b32.xlu1 %v1987_v41, %s1814_s15  ;;  %v2042_v59 = vmul.f32 %v1990_v42, %v145_v54  ;;  %168 = vrot.lane.b32.xlu0 %v145_v54, %s1814_s15  ;;  %v2046_v60 = vrot.slane %v1929_v27, %v811_v50  ;;  %v2049_v61 = vrot.slane %v1869_v9, %v811_v50  ;;  %v1006_v63 = vld [vmem:[%s4186_s2 + $0x1a8] sm:$0xff]  ;;  %v4190_v19 = vrot.slane %v1839_v1, 1  ;;  %v1133_v51 = vld [vmem:[%s4186_s2 + $0x5a0] sm:$0xff] }
   0xd   :  { %v1134_v14 = vld [vmem:[%s4186_s2 + $0x5a8] sm:$0xff]  ;;  %v2064_v15 = vsel %vm660_vm2, %v4191_v22, %v4199_v56  ;;  %v2067_v18 = vrot.slane %v1889_v16, %v811_v50  ;;  %v4193_v23 = vrot.slane %v1980_v39, 1  ;;  %1300 = vmatprep.subr.mxu1 %v1138_v52  ;;  %1212 = vmatpush1.msra.mxu0 %v1009_v53  ;;  %v2085_v45 = vsel %vm660_vm2, %v4189_v57, %v4194_v62  ;;  %v997_v56 = vld [vmem:[%s4186_s2 + $0x160] sm:$0xff] }
   0xe   :  { %4265 = vst [vmem:[#allocation6_spill] sm:$0xff] %v2046_v60  ;;  %4266 = vst [vmem:[#allocation7_spill] sm:$0xff] %v2049_v61  ;;  %v2073_v37 = vmul.f32 %v2046_v60, %v2032_v55  ;;  %v2077_v40 = vmul.f32 %v2049_v61, %v2064_v15  ;;  %v2088_v46 = vrot.slane %v1849_v3, %v811_v50  ;;  %v2093_v47 = vld [vmem:[%s4184_s0 + $0x48] sm:$0xff]  ;;  %1301 = vmatpush1.msra.mxu1 %v1137_v58 }
   0xf   :  { %4267 = vst [vmem:[#allocation8_spill] sm:$0xff] %v2067_v18  ;;  %v2103_v52 = vmul.f32 %v2067_v18, %v2085_v45  ;;  %v2111_v50 = vsel %vm660_vm2, %v4190_v19, %v4193_v23  ;;  %v4198_v53 = vrot.slane %v1934_v28, 7  ;;  %v4195_v58 = vrot.slane %v1951_v33, 7  ;;  %1213 = vmatprep.subr.mxu0 %v1006_v63  ;;  %1302 = vmatprep.subr.mxu1 %v1134_v14  ;;  %v1002_v57 = vld [vmem:[%s4186_s2 + $0x188] sm:$0xff]  ;;  %v1001_v14 = vld [vmem:[%s4186_s2 + $0x180] sm:$0xff] }
  0x10   :  { %4268 = vst [vmem:[#allocation9_spill] sm:$0xff] %v2088_v46  ;;  %315 = vrot.lane.b32.xlu1 %v145_v54, %s1815_s22  ;;  %307 = vrot.lane.b32.xlu0 %v1942_v30, %s1815_s22  ;;  %v2128_v19 = vmul.f32 %v2088_v46, %v2111_v50  ;;  %v4196_v22 = vrot.slane %v1956_v34, 7  ;;  %v4197_v43 = vrot.slane %v1980_v39, 7  ;;  %v1130_v63 = vld [vmem:[%s4186_s2 + $0x588] sm:$0xff]  ;;  %v4201_v23 = vrot.slane %v2093_v47, 7  ;;  %v1117_v18 = vld [vmem:[%s4186_s2 + $0x520] sm:$0xff] }
  0x11   :  { %v2144_v30 = vsel %vm107_vm0, %v92_v32, %v4198_v53  ;;  %v2152_v54 = vsel %vm107_vm0, %v91_v10, %v4195_v58  ;;  %1214 = vmatpush1.msra.mxu0 %v1005_v49  ;;  %1303 = vmatpush1.msra.mxu1 %v1133_v51  ;;  %v2182_v51 = vld [vmem:[%s4184_s0 + $0x58] sm:$0xff]  ;;  %v1129_v58 = vld [vmem:[%s4186_s2 + $0x580] sm:$0xff]  ;;  %v1126_v53 = vld [vmem:[%s4186_s2 + $0x568] sm:$0xff]  ;;  %v4209_v46 = vrot.slane %v2093_v47, 1  ;;  %v4281_v61 = vrot.slane %v1951_v33, 1 }
  0x12   :  { %v2157_v62 = vmul.f32 %v1990_v42, %v2144_v30  ;;  %v2161_v32 = vmul.f32 %v1923_v25, %v2152_v54  ;;  %v2169_v10 = vsel %vm107_vm0, %v94_v20, %v4196_v22  ;;  %v2177_v49 = vsel %vm107_vm0, %v93_v5, %v4197_v43  ;;  %1215 = vmatprep.subr.mxu0 %v1002_v57  ;;  %v998_v20 = vld [vmem:[%s4186_s2 + $0x168] sm:$0xff]  ;;  %v2202_v57 = vld [vmem:[%s4184_s0 + $0x50] sm:$0xff] }
  0x13   :  { %v2192_v22 = vmul.f32 %v1945_v31, %v2169_v10  ;;  %v2196_v5 = vmul.f32 %v1920_v24, %v2177_v49  ;;  %v4203_v43 = vrot.slane %v2118_v0, 7  ;;  %1304 = vmatprep.subr.mxu1 %v1130_v63  ;;  %1216 = vmatpush1.msra.mxu0 %v1001_v14  ;;  %v2220_v63 = vsel %vm107_vm0, %v4201_v23, %v104_v38  ;;  %v1125_v14 = vld [vmem:[%s4186_s2 + $0x560] sm:$0xff]  ;;  %v994_v44 = vld [vmem:[%s4186_s2 + $0x148] sm:$0xff] }
  0x14   :  { %4269 = vst [vmem:[#allocation10_spill] sm:$0xff] %v2157_v62  ;;  %4270 = vst [vmem:[#allocation11_spill] sm:$0xff] %v2161_v32  ;;  %331 = vrot.lane.b32.xlu1 %v1987_v41, %s1815_s22  ;;  %323 = vrot.lane.b32.xlu0 %v1938_v29, %s1815_s22  ;;  %v1122_v38 = vld [vmem:[%s4186_s2 + $0x548] sm:$0xff]  ;;  %v993_v41 = vld [vmem:[%s4186_s2 + $0x140] sm:$0xff]  ;;  %v4208_v23 = vrot.slane %v2182_v51, 7  ;;  %v4210_v6 = vrot.slane %v2202_v57, 7 }
  0x15   :  { %4271 = vst [vmem:[#allocation12_spill] sm:$0xff] %v2192_v22  ;;  %4272 = vst [vmem:[#allocation13_spill] sm:$0xff] %v2196_v5  ;;  %v2234_v29 = vsel %vm107_vm0, %v4203_v43, %v103_v11  ;;  %1305 = vmatpush1.msra.mxu1 %v1129_v58  ;;  %1217 = vmatprep.subr.mxu0 %v998_v20  ;;  %v1121_v11 = vld [vmem:[%s4186_s2 + $0x540] sm:$0xff]  ;;  %v40_v58 = vadd.s32 8, %v1852_v4  ;;  %v4285_v60 = vrot.slane %v1980_v39, 1 }
  0x16   :  { %4273 = vst [vmem:[#allocation14_spill] sm:$0xff] %v2220_v63  ;;  %4274 = vst [vmem:[#allocation15_spill] sm:$0xff] %v2234_v29  ;;  %1306 = vmatprep.subr.mxu1 %v1126_v53  ;;  %1218 = vmatpush1.msra.mxu0 %v997_v56  ;;  %v990_v56 = vld [vmem:[%s4186_s2 + $0x128] sm:$0xff]  ;;  %v2267_v20 = vsel %vm107_vm0, %v4208_v23, %v106_v26  ;;  %v957_v24 = vld [vmem:[%s4186_s2 + $0x20] sm:$0xff] }
  0x17   :  { %1307 = vmatpush1.msra.mxu1 %v1125_v14  ;;  %1219 = vmatprep.subr.mxu0 %v994_v44  ;;  %v1118_v53 = vld [vmem:[%s4186_s2 + $0x528] sm:$0xff]  ;;  %v989_v44 = vld [vmem:[%s4186_s2 + $0x120] sm:$0xff]  ;;  %4275 = vst [vmem:[#allocation16_spill] sm:$0xff] %v2267_v20  ;;  %v4276_v14 = vrot.slane %v1844_v2, 7  ;;  %v54_v23 = vand.u32 15, %v40_v58 }
  0x18   :  { %412 = vrot.lane.b32.xlu1 %v1894_v17, %s1814_s15  ;;  %404 = vrot.lane.b32.xlu0 %v1859_v7, %s1814_s15  ;;  %v986_v26 = vld [vmem:[%s4186_s2 + $0x108] sm:$0xff] }
  0x19   :  { %v2275_v43 = vsel %vm107_vm0, %v4210_v6, %v4276_v14  ;;  %1308 = vmatprep.subr.mxu1 %v1122_v38  ;;  %1220 = vmatpush1.msra.mxu0 %v993_v41  ;;  %v1114_v38 = vld [vmem:[%s4186_s2 + $0x508] sm:$0xff]  ;;  %v985_v41 = vld [vmem:[%s4186_s2 + $0x100] sm:$0xff]  ;;  %v4213_v14 = vrot.slane %v2118_v0, 1  ;;  %vm2307_vm3 = vcmp.lt.s32.totalorder %v54_v23, 15 }
  0x1a   :  { %4277 = vst [vmem:[#allocation17_spill] sm:$0xff] %v2275_v43  ;;  %1309 = vmatpush1.msra.mxu1 %v1121_v11  ;;  %1221 = vmatprep.subr.mxu0 %v990_v56  ;;  %v4278_v11 = vrot.slane %v1934_v28, 1  ;;  %v1102_v58 = vld [vmem:[%s4186_s2 + $0x4a8] sm:$0xff] }
  0x1b   :  { %1310 = vmatprep.subr.mxu1 %v1118_v53  ;;  %1222 = vmatpush1.msra.mxu0 %v989_v44  ;;  %v1113_v53 = vld [vmem:[%s4186_s2 + $0x500] sm:$0xff]  ;;  %v982_v44 = vld [vmem:[%s4186_s2 + $0xe8] sm:$0xff]  ;;  %v665_v23 = vsel %vm660_vm2, %v4281_v61, %v4213_v14  ;;  %v4284_v14 = vrot.slane %v2202_v57, 1 }
  0x1c   :  { %v666_v56 = vsel %vm660_vm2, %v4278_v11, %v4209_v46  ;;  %428 = vrot.lane.b32.xlu1 %v1876_v12, %s1814_s15  ;;  %420 = vrot.lane.b32.xlu0 %v1839_v1, %s1814_s15  ;;  %v1110_v11 = vld [vmem:[%s4186_s2 + $0x4e8] sm:$0xff]  ;;  %v4283_v46 = vrot.slane %v1956_v34, 1 }
  0x1d   :  { %1311 = vmatpush1.msra.mxu1 %v1117_v18  ;;  %1223 = vmatprep.subr.mxu0 %v986_v26  ;;  %v2315_v6 = vsel %vm2307_vm3, %v666_v56, 0.0  ;;  %v981_v18 = vld [vmem:[%s4186_s2 + $0xe0] sm:$0xff]  ;;  %v2331_v26 = vsel %vm2307_vm3, %v665_v23, 0.0  ;;  %v4282_v56 = vrot.slane %v2182_v51, 1 }
  0x1e   :  { %1312 = vmatprep.subr.mxu1 %v1114_v38  ;;  %1224 = vmatpush1.msra.mxu0 %v985_v41  ;;  %v1109_v38 = vld [vmem:[%s4186_s2 + $0x4e0] sm:$0xff]  ;;  %v978_v41 = vld [vmem:[%s4186_s2 + $0xc8] sm:$0xff] }
  0x1f   :  { %v668_v61 = vsel %vm660_vm2, %v4283_v46, %v4282_v56  ;;  %1313 = vmatpush1.msra.mxu1 %v1113_v53  ;;  %1225 = vmatprep.subr.mxu0 %v982_v44  ;;  %v667_v46 = vsel %vm660_vm2, %v4285_v60, %v4284_v14  ;;  %v1106_v53 = vld [vmem:[%s4186_s2 + $0x4c8] sm:$0xff]  ;;  %v977_v44 = vld [vmem:[%s4186_s2 + $0xc0] sm:$0xff] }
  0x20   :  { %v2347_v23 = vsel %vm2307_vm3, %v668_v61, 0.0  ;;  %556 = vrot.lane.b32.xlu1 %v1894_v17, %s1815_s22  ;;  %548 = vrot.lane.b32.xlu0 %v1859_v7, %s1815_s22  ;;  %v2367_v56 = vsel %vm2307_vm3, %v667_v46, 0.0  ;;  %v1105_v60 = vld [vmem:[%s4186_s2 + $0x4c0] sm:$0xff]  ;;  %v974_v14 = vld [vmem:[%s4186_s2 + $0xa8] sm:$0xff] }
  0x21   :  { %1314 = vmatprep.subr.mxu1 %v1110_v11  ;;  %1226 = vmatpush1.msra.mxu0 %v981_v18  ;;  %v973_v11 = vld [vmem:[%s4186_s2 + $0xa0] sm:$0xff]  ;;  %v970_v61 = vld [vmem:[%s4186_s2 + $0x88] sm:$0xff] }
  0x22   :  { %1315 = vmatpush1.msra.mxu1 %v1109_v38  ;;  %1227 = vmatprep.subr.mxu0 %v978_v41  ;;  %v1101_v18 = vld [vmem:[%s4186_s2 + $0x4a0] sm:$0xff]  ;;  %v1098_v38 = vld [vmem:[%s4186_s2 + $0x488] sm:$0xff] }
  0x23   :  { %1316 = vmatprep.subr.mxu1 %v1106_v53  ;;  %1228 = vmatpush1.msra.mxu0 %v977_v44  ;;  %v969_v41 = vld [vmem:[%s4186_s2 + $0x80] sm:$0xff]  ;;  %v966_v53 = vld [vmem:[%s4186_s2 + $0x68] sm:$0xff] }
  0x24   :  { %572 = vrot.lane.b32.xlu1 %v1876_v12, %s1815_s22  ;;  %564 = vrot.lane.b32.xlu0 %v1839_v1, %s1815_s22  ;;  %v1097_v46 = vld [vmem:[%s4186_s2 + $0x480] sm:$0xff]  ;;  %v1094_v44 = vld [vmem:[%s4186_s2 + $0x468] sm:$0xff] }
  0x25   :  { %1317 = vmatpush1.msra.mxu1 %v1105_v60  ;;  %1229 = vmatprep.subr.mxu0 %v974_v14  ;;  %v965_v60 = vld [vmem:[%s4186_s2 + $0x60] sm:$0xff] }
  0x26   :  { %1318 = vmatprep.subr.mxu1 %v1102_v58  ;;  %1230 = vmatpush1.msra.mxu0 %v973_v11  ;;  %v1093_v14 = vld [vmem:[%s4186_s2 + $0x460] sm:$0xff]  ;;  %v962_v58 = vld [vmem:[%s4186_s2 + $0x48] sm:$0xff] }
  0x27   :  { %1319 = vmatpush1.msra.mxu1 %v1101_v18  ;;  %1231 = vmatprep.subr.mxu0 %v970_v61  ;;  %v1090_v11 = vld [vmem:[%s4186_s2 + $0x448] sm:$0xff]  ;;  %v961_v18 = vld [vmem:[%s4186_s2 + $0x40] sm:$0xff]  ;;  %v42_v61 = vadd.s32 24, %v1852_v4 }
  0x28   :  { %721 = vrot.lane.b32.xlu1 %v2032_v55, %s1814_s15  ;;  %713 = vrot.lane.b32.xlu0 %v2064_v15, %s1814_s15 }
  0x29   :  { %1320 = vmatprep.subr.mxu1 %v1098_v38  ;;  %1232 = vmatpush1.msra.mxu0 %v969_v41  ;;  %v1089_v38 = vld [vmem:[%s4186_s2 + $0x440] sm:$0xff]  ;;  %v958_v41 = vld [vmem:[%s4186_s2 + $0x28] sm:$0xff] }
  0x2a   :  { %1321 = vmatpush1.msra.mxu1 %v1097_v46  ;;  %1233 = vmatprep.subr.mxu0 %v966_v53  ;;  %v4221_v46 = vrot.slane %v1912_v21, 1  ;;  %v4218_v53 = vrot.slane %v1864_v8, 1 }
  0x2b   :  { %1322 = vmatprep.subr.mxu1 %v1094_v44  ;;  %1234 = vmatpush1.msra.mxu0 %v965_v60  ;;  %v68_v44 = vand.u32 15, %v42_v61  ;;  %v1086_v60 = vld [vmem:[%s4186_s2 + $0x428] sm:$0xff]  ;;  %v1201_v61 = vld [vmem:[%s4186_s2 + $0x7c0] sm:$0xff] }
  0x2c   :  { %737 = vrot.lane.b32.xlu1 %v2085_v45, %s1814_s15  ;;  %729 = vrot.lane.b32.xlu0 %v2111_v50, %s1814_s15 }
  0x2d   :  { %1323 = vmatpush1.msra.mxu1 %v1093_v14  ;;  %1235 = vmatprep.subr.mxu0 %v962_v58  ;;  %v1085_v14 = vld [vmem:[%s4186_s2 + $0x420] sm:$0xff]  ;;  %v954_v58 = vld [vmem:[%s4186_s2 + $0x8] sm:$0xff]  ;;  %vm2456_vm4 = vcmp.lt.s32.totalorder %v68_v44, 15 }
  0x2e   :  { %1324 = vmatprep.subr.mxu1 %v1090_v11  ;;  %1236 = vmatpush1.msra.mxu0 %v961_v18  ;;  %v4286_v11 = vrot.slane %v1894_v17, 1  ;;  %v1082_v17 = vld [vmem:[%s4186_s2 + $0x408] sm:$0xff]  ;;  %v953_v44 = vld [vmem:[%s4186_s2] sm:$0xff] }
  0x2f   :  { %1325 = vmatpush1.msra.mxu1 %v1089_v38  ;;  %1237 = vmatprep.subr.mxu0 %v958_v41  ;;  %v4289_v38 = vrot.slane %v1859_v7, 1 }
  0x30   :  { %v674_v18 = vsel %vm660_vm2, %v4221_v46, %v4286_v11  ;;  %865 = vrot.lane.b32.xlu1 %v2032_v55, %s1815_s22  ;;  %857 = vrot.lane.b32.xlu0 %v2064_v15, %s1815_s22  ;;  %v4220_v55 = vrot.slane %v1881_v13, 1  ;;  %v4219_v15 = vrot.slane %v1844_v2, 1 }
  0x31   :  { %v673_v41 = vsel %vm660_vm2, %v4218_v53, %v4289_v38  ;;  %v2478_v11 = vsel %vm2456_vm4, %v674_v18, 0.0  ;;  %1326 = vmatprep.subr.mxu1 %v1086_v60  ;;  %1238 = vmatpush1.msra.mxu0 %v957_v24  ;;  %v1081_v53 = vld [vmem:[%s4186_s2 + $0x400] sm:$0xff]  ;;  %v1078_v18 = vld [vmem:[%s4186_s2 + $0x3e8] sm:$0xff] }
  0x32   :  { %4290 = vst [vmem:[#allocation18_spill] sm:$0xff] %v2478_v11  ;;  %v2482_v38 = vsel %vm2456_vm4, %v673_v41, 0.0  ;;  %1327 = vmatpush1.msra.mxu1 %v1085_v14  ;;  %1239 = vmatprep.subr.mxu0 %v954_v58  ;;  %v1206_v24 = vld [vmem:[%s4186_s2 + $0x7e8] sm:$0xff]  ;;  %v1077_v60 = vld [vmem:[%s4186_s2 + $0x3e0] sm:$0xff]  ;;  %v4292_v14 = vrot.slane %v1876_v12, 1  ;;  %v4293_v41 = vrot.slane %v1839_v1, 1 }
  0x33   :  { %4291 = vst [vmem:[#allocation19_spill] sm:$0xff] %v2482_v38  ;;  %1328 = vmatprep.subr.mxu1 %v1082_v17  ;;  %1240 = vmatpush1.msra.mxu0 %v953_v44  ;;  %v1205_v12 = vld [vmem:[%s4186_s2 + $0x7e0] sm:$0xff]  ;;  %v1074_v44 = vld [vmem:[%s4186_s2 + $0x3c8] sm:$0xff] }
  0x34   :  { %v676_v58 = vsel %vm660_vm2, %v4220_v55, %v4292_v14  ;;  %v675_v17 = vsel %vm660_vm2, %v4219_v15, %v4293_v41  ;;  %881 = vrot.lane.b32.xlu1 %v2085_v45, %s1815_s22  ;;  %873 = vrot.lane.b32.xlu0 %v2111_v50, %s1815_s22  ;;  %v1202_v45 = vld [vmem:[%s4186_s2 + $0x7c8] sm:$0xff]  ;;  %v1073_v50 = vld [vmem:[%s4186_s2 + $0x3c0] sm:$0xff]  ;;  %v598_v15 = vsub.s32 5, %v1852_v4 }
  0x35   :  { %v2522_v1 = vsel %vm2456_vm4, %v676_v58, 0.0  ;;  %v2526_v14 = vsel %vm2456_vm4, %v675_v17, 0.0  ;;  %1329 = vmatpush1.msra.mxu1 %v1081_v53  ;;  %1241 = vmatprep.subr.mxu0 %v1078_v18  ;;  %v1070_v53 = vld [vmem:[%s4186_s2 + $0x3a8] sm:$0xff]  ;;  %v1197_v58 = vld [vmem:[%s4186_s2 + $0x7a0] sm:$0xff] }
  0x36   :  { %4294 = vst [vmem:[#allocation20_spill] sm:$0xff] %v2522_v1  ;;  %4295 = vst [vmem:[#allocation21_spill] sm:$0xff] %v2526_v14  ;;  %1330 = vmatprep.subr.mxu1 %v1206_v24  ;;  %1242 = vmatpush2.msra.mxu0 %v1077_v60  ;;  %v1198_v18 = vld [vmem:[%s4186_s2 + $0x7a8] sm:$0xff]  ;;  %v1069_v24 = vld [vmem:[%s4186_s2 + $0x3a0] sm:$0xff]  ;;  %v41_v60 = vadd.s32 16, %v1852_v4  ;;  %v2904_v1 = vrot.slane %v1889_v16, %v598_v15 }
  0x37   :  { %1331 = vmatpush2.msra.mxu1 %v1205_v12  ;;  %1243 = vmatprep.subr.mxu0 %v1074_v44  ;;  %v1066_v41 = vld [vmem:[%s4186_s2 + $0x388] sm:$0xff]  ;;  %v1065_v12 = vld [vmem:[%s4186_s2 + $0x380] sm:$0xff] }
  0x38   :  { %170 = vrot.lane.b32.xlu1 %v2144_v30, %s1814_s15  ;;  %162 = vrot.lane.b32.xlu0 %v2152_v54, %s1814_s15  ;;  %v1194_v17 = vld [vmem:[%s4186_s2 + $0x788] sm:$0xff]  ;;  %v1193_v44 = vld [vmem:[%s4186_s2 + $0x780] sm:$0xff] }
  0x39   :  { %1332 = vmatprep.subr.mxu1 %v1202_v45  ;;  %1244 = vmatpush2.msra.mxu0 %v1073_v50  ;;  %v1062_v45 = vld [vmem:[%s4186_s2 + $0x368] sm:$0xff]  ;;  %v61_v50 = vand.u32 15, %v41_v60 }
  0x3a   :  { %1333 = vmatpush2.msra.mxu1 %v1201_v61  ;;  %1245 = vmatprep.subr.mxu0 %v1070_v53  ;;  %v1190_v61 = vld [vmem:[%s4186_s2 + $0x768] sm:$0xff]  ;;  %v1061_v53 = vld [vmem:[%s4186_s2 + $0x360] sm:$0xff] }
  0x3b   :  { %1334 = vmatprep.subr.mxu1 %v1198_v18  ;;  %1246 = vmatpush2.msra.mxu0 %v1069_v24  ;;  %v1189_v18 = vld [vmem:[%s4186_s2 + $0x760] sm:$0xff]  ;;  %v1058_v24 = vld [vmem:[%s4186_s2 + $0x348] sm:$0xff]  ;;  %vm2601_vm5 = vcmp.ge.s32.totalorder %v61_v50, 1 }
  0x3c   :  { %186 = vrot.lane.b32.xlu1 %v2169_v10, %s1814_s15  ;;  %178 = vrot.lane.b32.xlu0 %v2177_v49, %s1814_s15  ;;  %v1186_v60 = vld [vmem:[%s4186_s2 + $0x748] sm:$0xff] }
  0x3d   :  { %1335 = vmatpush2.msra.mxu1 %v1197_v58  ;;  %1247 = vmatprep.subr.mxu0 %v1066_v41  ;;  %v1057_v58 = vld [vmem:[%s4186_s2 + $0x340] sm:$0xff]  ;;  %v4296_v41 = vrot.slane %v2093_v47, 7  ;;  %v1054_v50 = vld [vmem:[%s4186_s2 + $0x328] sm:$0xff] }
  0x3e   :  { %1336 = vmatprep.subr.mxu1 %v1194_v17  ;;  %1248 = vmatpush2.msra.mxu0 %v1065_v12  ;;  %v4297_v17 = vrot.slane %v1934_v28, 7  ;;  %v1170_v12 = vld [vmem:[%s4186_s2 + $0x6c8] sm:$0xff] }
  0x3f   :  { %1337 = vmatpush2.msra.mxu1 %v1193_v44  ;;  %1249 = vmatprep.subr.mxu0 %v1062_v45  ;;  %v4301_v44 = vrot.slane %v1951_v33, 7 }
  0x40   :  { %317 = vrot.lane.b32.xlu1 %v2144_v30, %s1815_s22  ;;  %309 = vrot.lane.b32.xlu0 %v2152_v54, %s1815_s22  ;;  %v113_v30 = vsel %vm107_vm0, %v4297_v17, %v4296_v41  ;;  %v4300_v54 = vrot.slane %v2118_v0, 7  ;;  %v1053_v41 = vld [vmem:[%s4186_s2 + $0x320] sm:$0xff] }
  0x41   :  { %1338 = vmatprep.subr.mxu1 %v1190_v61  ;;  %1250 = vmatpush2.msra.mxu0 %v1061_v53  ;;  %v1185_v61 = vld [vmem:[%s4186_s2 + $0x740] sm:$0xff]  ;;  %v1182_v53 = vld [vmem:[%s4186_s2 + $0x728] sm:$0xff] }
  0x42   :  { %v112_v45 = vsel %vm107_vm0, %v4301_v44, %v4300_v54  ;;  %1339 = vmatpush2.msra.mxu1 %v1189_v18  ;;  %1251 = vmatprep.subr.mxu0 %v1058_v24  ;;  %v1181_v18 = vld [vmem:[%s4186_s2 + $0x720] sm:$0xff]  ;;  %v1050_v24 = vld [vmem:[%s4186_s2 + $0x308] sm:$0xff]  ;;  %v4306_v54 = vrot.slane %v2202_v57, 7  ;;  %v4307_v44 = vrot.slane %v1980_v39, 7 }
  0x43   :  { %1340 = vmatprep.subr.mxu1 %v1186_v60  ;;  %1252 = vmatpush2.msra.mxu0 %v1057_v58  ;;  %v2635_v60 = vsel %vm2601_vm5, %v113_v30, 0.0  ;;  %v2639_v58 = vsel %vm2601_vm5, %v112_v45, 0.0  ;;  %v1178_v45 = vld [vmem:[%s4186_s2 + $0x708] sm:$0xff] }
  0x44   :  { %333 = vrot.lane.b32.xlu1 %v2169_v10, %s1815_s22  ;;  %325 = vrot.lane.b32.xlu0 %v2177_v49, %s1815_s22  ;;  %4302 = vst [vmem:[#allocation22_spill] sm:$0xff] %v2635_v60  ;;  %4303 = vst [vmem:[#allocation23_spill] sm:$0xff] %v2639_v58  ;;  %v4304_v10 = vrot.slane %v2182_v51, 7  ;;  %v4305_v49 = vrot.slane %v1956_v34, 7  ;;  %v114_v30 = vsel %vm107_vm0, %v4307_v44, %v4306_v54  ;;  %v1042_v54 = vld [vmem:[%s4186_s2 + $0x2c8] sm:$0xff]  ;;  %v1169_v44 = vld [vmem:[%s4186_s2 + $0x6c0] sm:$0xff] }
  0x45   :  { %1341 = vmatpush2.msra.mxu1 %v1185_v61  ;;  %1253 = vmatprep.subr.mxu0 %v1054_v50  ;;  %v1049_v61 = vld [vmem:[%s4186_s2 + $0x300] sm:$0xff] }
  0x46   :  { %v115_v17 = vsel %vm107_vm0, %v4305_v49, %v4304_v10  ;;  %1342 = vmatprep.subr.mxu1 %v1182_v53  ;;  %1254 = vmatpush2.msra.mxu0 %v1053_v41  ;;  %v1177_v50 = vld [vmem:[%s4186_s2 + $0x700] sm:$0xff]  ;;  %v1046_v10 = vld [vmem:[%s4186_s2 + $0x2e8] sm:$0xff] }
  0x47   :  { %1343 = vmatpush2.msra.mxu1 %v1181_v18  ;;  %1255 = vmatprep.subr.mxu0 %v1050_v24  ;;  %v1174_v53 = vld [vmem:[%s4186_s2 + $0x6e8] sm:$0xff]  ;;  %v1045_v41 = vld [vmem:[%s4186_s2 + $0x2e0] sm:$0xff]  ;;  %v2677_v18 = vsel %vm2601_vm5, %v115_v17, 0.0  ;;  %v2681_v24 = vsel %vm2601_vm5, %v114_v30, 0.0 }
  0x48   :  { %172 = vrot.lane.b32.xlu1 %v2635_v60, %s1814_s15  ;;  %164 = vrot.lane.b32.xlu0 %v2639_v58, %s1814_s15  ;;  %4308 = vst [vmem:[#allocation24_spill] sm:$0xff] %v2677_v18  ;;  %4309 = vst [vmem:[#allocation25_spill] sm:$0xff] %v2681_v24  ;;  %v1173_v49 = vld [vmem:[%s4186_s2 + $0x6e0] sm:$0xff]  ;;  %v1038_v30 = vld [vmem:[%s4186_s2 + $0x2a8] sm:$0xff] }
  0x49   :  { %1344 = vmatprep.subr.mxu1 %v1178_v45  ;;  %1256 = vmatpush2.msra.mxu0 %v1049_v61  ;;  %v1041_v17 = vld [vmem:[%s4186_s2 + $0x2c0] sm:$0xff]  ;;  %v1166_v45 = vld [vmem:[%s4186_s2 + $0x6a8] sm:$0xff] }
  0x4a   :  { %1345 = vmatpush2.msra.mxu1 %v1177_v50  ;;  %1257 = vmatprep.subr.mxu0 %v1046_v10  ;;  %v1037_v61 = vld [vmem:[%s4186_s2 + $0x2a0] sm:$0xff]  ;;  %v1034_v10 = vld [vmem:[%s4186_s2 + $0x288] sm:$0xff] }
  0x4b   :  { %1346 = vmatprep.subr.mxu1 %v1174_v53  ;;  %1258 = vmatpush2.msra.mxu0 %v1045_v41  ;;  %v1165_v50 = vld [vmem:[%s4186_s2 + $0x6a0] sm:$0xff]  ;;  %v1162_v53 = vld [vmem:[%s4186_s2 + $0x688] sm:$0xff] }
  0x4c   :  { %188 = vrot.lane.b32.xlu1 %v2677_v18, %s1814_s15  ;;  %180 = vrot.lane.b32.xlu0 %v2681_v24, %s1814_s15  ;;  %v1033_v41 = vld [vmem:[%s4186_s2 + $0x280] sm:$0xff] }
  0x4d   :  { %1347 = vmatpush2.msra.mxu1 %v1173_v49  ;;  %1259 = vmatprep.subr.mxu0 %v1042_v54  ;;  %v1161_v49 = vld [vmem:[%s4186_s2 + $0x680] sm:$0xff]  ;;  %v1030_v54 = vld [vmem:[%s4186_s2 + $0x268] sm:$0xff] }
  0x4e   :  { %1348 = vmatprep.subr.mxu1 %v1170_v12  ;;  %1260 = vmatpush2.msra.mxu0 %v1041_v17  ;;  %v1158_v12 = vld [vmem:[%s4186_s2 + $0x668] sm:$0xff]  ;;  %v1029_v17 = vld [vmem:[%s4186_s2 + $0x260] sm:$0xff] }
  0x4f   :  { %1349 = vmatpush2.msra.mxu1 %v1169_v44  ;;  %1261 = vmatprep.subr.mxu0 %v1038_v30  ;;  %v1157_v44 = vld [vmem:[%s4186_s2 + $0x660] sm:$0xff]  ;;  %v1026_v30 = vld [vmem:[%s4186_s2 + $0x248] sm:$0xff] }
  0x50   :  { %414 = vrot.lane.b32.xlu1 %v1934_v28, %s1814_s15  ;;  %406 = vrot.lane.b32.xlu0 %v1951_v33, %s1814_s15 }
  0x51   :  { %1350 = vmatprep.subr.mxu1 %v1166_v45  ;;  %1262 = vmatpush2.msra.mxu0 %v1037_v61  ;;  %v1154_v45 = vld [vmem:[%s4186_s2 + $0x648] sm:$0xff]  ;;  %v1025_v61 = vld [vmem:[%s4186_s2 + $0x240] sm:$0xff] }
  0x52   :  { %1351 = vmatpush2.msra.mxu1 %v1165_v50  ;;  %1263 = vmatprep.subr.mxu0 %v1034_v10  ;;  %v1153_v50 = vld [vmem:[%s4186_s2 + $0x640] sm:$0xff]  ;;  %v1022_v10 = vld [vmem:[%s4186_s2 + $0x228] sm:$0xff] }
  0x53   :  { %1352 = vmatprep.subr.mxu1 %v1162_v53  ;;  %1264 = vmatpush2.msra.mxu0 %v1033_v41  ;;  %v1150_v53 = vld [vmem:[%s4186_s2 + $0x628] sm:$0xff]  ;;  %v1021_v41 = vld [vmem:[%s4186_s2 + $0x220] sm:$0xff] }
  0x54   :  { %430 = vrot.lane.b32.xlu1 %v1956_v34, %s1814_s15  ;;  %422 = vrot.lane.b32.xlu0 %v1980_v39, %s1814_s15 }
  0x55   :  { %1353 = vmatpush2.msra.mxu1 %v1161_v49  ;;  %1265 = vmatprep.subr.mxu0 %v1030_v54  ;;  %v1149_v49 = vld [vmem:[%s4186_s2 + $0x620] sm:$0xff]  ;;  %v1018_v54 = vld [vmem:[%s4186_s2 + $0x208] sm:$0xff] }
  0x56   :  { %1354 = vmatprep.subr.mxu1 %v1158_v12  ;;  %1266 = vmatpush2.msra.mxu0 %v1029_v17  ;;  %v1146_v12 = vld [vmem:[%s4186_s2 + $0x608] sm:$0xff]  ;;  %v1017_v17 = vld [vmem:[%s4186_s2 + $0x200] sm:$0xff] }
  0x57   :  { %1355 = vmatpush2.msra.mxu1 %v1157_v44  ;;  %1267 = vmatprep.subr.mxu0 %v1026_v30  ;;  %v1145_v44 = vld [vmem:[%s4186_s2 + $0x600] sm:$0xff] }
  0x58   :  { %319 = vrot.lane.b32.xlu1 %v2635_v60, %s1815_s22  ;;  %311 = vrot.lane.b32.xlu0 %v2639_v58, %s1815_s22 }
  0x59   :  { %1356 = vmatprep.subr.mxu1 %v1154_v45  ;;  %1268 = vmatpush2.msra.mxu0 %v1025_v61 }
  0x5a   :  { %1357 = vmatpush2.msra.mxu1 %v1153_v50  ;;  %1269 = vmatprep.subr.mxu0 %v1022_v10  ;;  %v4310_v10 = vlaneseq }
  0x5b   :  { %1358 = vmatprep.subr.mxu1 %v1150_v53  ;;  %1270 = vmatpush2.msra.mxu0 %v1021_v41  ;;  %v213_v41 = vsub.s32 0, %v1852_v4 }
  0x5c   :  { %335 = vrot.lane.b32.xlu1 %v2677_v18, %s1815_s22  ;;  %327 = vrot.lane.b32.xlu0 %v2681_v24, %s1815_s22  ;;  %v2833_v53 = vand.u32 127, %v4310_v10  ;;  %v502_v10 = vsub.s32 4, %v1852_v4 }
  0x5d   :  { %1359 = vmatpush2.msra.mxu1 %v1149_v49  ;;  %1271 = vmatprep.subr.mxu0 %v1018_v54  ;;  %v358_v49 = vsub.s32 2, %v1852_v4  ;;  %v2858_v55 = vrot.slane %v1849_v3, %v213_v41 }
  0x5e   :  { %1360 = vmatprep.subr.mxu1 %v1146_v12  ;;  %1272 = vmatpush2.msra.mxu0 %v1017_v17  ;;  %vm194_vm6 = vcmp.lt.s32.totalorder %v2833_v53, 32  ;;  %vm339_vm7 = vcmp.lt.s32.totalorder %v2833_v53, 96  ;;  %v2844_v17 = vrot.slane %v1869_v9, %v213_v41  ;;  %v2879_v18 = vrot.slane %v1869_v9, %v502_v10 }
  0x5f   :  { %1361 = vmatpush2.msra.mxu1 %v1145_v44  ;;  %v454_v44 = vsub.s32 3, %v1852_v4  ;;  %v2861_v46 = vrot.slane %v1869_v9, %v358_v49  ;;  %v2901_v14 = vrot.slane %v1889_v16, %v502_v10 }
  0x60   :  { %174 = vrot.lane.b32.xlu1 %v2220_v63, %s1814_s15  ;;  %166 = vrot.lane.b32.xlu0 %v2234_v29, %s1814_s15  ;;  %4311 = vst [vmem:[#allocation26_spill] sm:$0xff] %v2844_v17  ;;  %4312 = vst [vmem:[#allocation27_spill] sm:$0xff] %v2879_v18 }
  0x61   :  { %v2882_v25 = vrot.slane %v1929_v27, %v454_v44  ;;  %v2885_v58 = vrot.slane %v1869_v9, %v454_v44  ;;  %v2888_v42 = vrot.slane %v1849_v3, %v454_v44  ;;  %v2891_v60 = vrot.slane %v1889_v16, %v454_v44 }
  0x64   :  { %190 = vrot.lane.b32.xlu1 %v2267_v20, %s1814_s15  ;;  %182 = vrot.lane.b32.xlu0 %v2275_v43, %s1814_s15 }
  0x68   :  { %416 = vrot.lane.b32.xlu1 %v2093_v47, %s1814_s15  ;;  %408 = vrot.lane.b32.xlu0 %v2118_v0, %s1814_s15 }
  0x6c   :  { %432 = vrot.lane.b32.xlu1 %v2182_v51, %s1814_s15  ;;  %424 = vrot.lane.b32.xlu0 %v2202_v57, %s1814_s15 }
  0x70   :  { %558 = vrot.lane.b32.xlu1 %v1934_v28, %s1815_s22  ;;  %550 = vrot.lane.b32.xlu0 %v1951_v33, %s1815_s22 }
  0x74   :  { %574 = vrot.lane.b32.xlu1 %v1956_v34, %s1815_s22  ;;  %566 = vrot.lane.b32.xlu0 %v1980_v39, %s1815_s22  ;;  %v1016_v34 = vld [vmem:[%s4186_s2 + $0x1f8] sm:$0xff] }
  0x75   :  { %v1144_v39 = vld [vmem:[%s4186_s2 + $0x5f8] sm:$0xff]  ;;  %1387 = vmatprep.subr.mxu0 %v1016_v34  ;;  %v2848_v34 = vrot.slane %v1889_v16, %v213_v41 }
  0x76   :  { %1476 = vmatprep.subr.mxu1 %v1144_v39  ;;  %v2851_v39 = vrot.slane %v1929_v27, %v213_v41  ;;  %v2876_v41 = vrot.slane %v1849_v3, %v358_v49 }
  0x78   :  { %321 = vrot.lane.b32.xlu1 %v2220_v63, %s1815_s22  ;;  %313 = vrot.lane.b32.xlu0 %v2234_v29, %s1815_s22 }
  0x7a   :  { %v177_v30 = vpop.permute.xlu1 %176  ;;  %v161_v45 = vpop.permute.xlu0 %160 }
  0x7c   :  { %337 = vrot.lane.b32.xlu1 %v2267_v20, %s1815_s22  ;;  %329 = vrot.lane.b32.xlu0 %v2275_v43, %s1815_s22  ;;  %v2864_v43 = vrot.slane %v1889_v16, %v358_v49  ;;  %v2867_v20 = vrot.slane %v1929_v27, %v358_v49  ;;  %v2898_v49 = vrot.slane %v1869_v9, %v598_v15 }
  0x7d   :  { %v2918_v16 = vmul.f32 %v2879_v18, %v1859_v7 }
  0x7e   :  { %v185_v28 = vpop.permute.xlu1 %184  ;;  %v169_v33 = vpop.permute.xlu0 %168 }
  0x7f   :  { %v207_v29 = vsel %vm194_vm6, %v185_v28, %v161_v45  ;;  %v203_v63 = vsel %vm194_vm6, %v161_v45, %v169_v33  ;;  %v195_v45 = vsel %vm194_vm6, %v177_v30, %v185_v28  ;;  %v199_v9 = vsel %vm194_vm6, %v169_v33, %v177_v30 }
  0x80   :  { %723 = vrot.lane.b32.xlu1 %v2315_v6, %s1814_s15  ;;  %715 = vrot.lane.b32.xlu0 %v2331_v26, %s1814_s15  ;;  %v227_v22 = vmul.f32 %v2844_v17, %v207_v29  ;;  %v228_v44 = vmul.f32 %v2851_v39, %v203_v63  ;;  %v2921_v63 = vrot.slane %v1929_v27, %v502_v10  ;;  %v2933_v33 = vsub.s32 6, %v1852_v4  ;;  %v1788_v4 = vld [vmem:[%s4185_s1] sm:$0xff] }
  0x81   :  { %v2924_v29 = vrot.slane %v1849_v3, %v502_v10  ;;  %v230_v7 = vmul.f32 %v2848_v34, %v195_v45  ;;  %v229_v17 = vmul.f32 %v2858_v55, %v199_v9 }
  0x82   :  { %v316_v61 = vpop.permute.xlu1 %315  ;;  %v308_v50 = vpop.permute.xlu0 %307 }
  0x83   :  { %v348_v5 = vsel %vm339_vm7, %v308_v50, %v316_v61 }
  0x84   :  { %739 = vrot.lane.b32.xlu1 %v2347_v23, %s1814_s15  ;;  %731 = vrot.lane.b32.xlu0 %v2367_v56, %s1814_s15  ;;  %v372_v18 = vmul.f32 %v2861_v46, %v348_v5 }
  0x86   :  { %v332_v54 = vpop.permute.xlu1 %331  ;;  %v324_v12 = vpop.permute.xlu0 %323 }
  0x87   :  { %v344_v28 = vsel %vm339_vm7, %v316_v61, %v324_v12  ;;  %v352_v61 = vsel %vm339_vm7, %v332_v54, %v308_v50  ;;  %v340_v3 = vsel %vm339_vm7, %v324_v12, %v332_v54  ;;  %v291_v50 = vadd.f32 %v1968_v36, %v227_v22 }
  0x88   :  { %418 = vrot.lane.b32.xlu1 %v1912_v21, %s1814_s15  ;;  %410 = vrot.lane.b32.xlu0 %v1864_v8, %s1814_s15  ;;  %v373_v10 = vmul.f32 %v2867_v20, %v344_v28  ;;  %v375_v5 = vmul.f32 %v2864_v43, %v352_v61  ;;  %v374_v28 = vmul.f32 %v2876_v41, %v340_v3 }
  0x89   :  { %v293_v3 = vadd.f32 %v1962_v35, %v229_v17 }
  0x8a   :  { %v413_v24 = vpop.permute.xlu1 %412  ;;  %v405_v31 = vpop.permute.xlu0 %404 }
  0x8b   :  { %v444_v11 = vsel %vm194_vm6, %v405_v31, %v413_v24 }
  0x8c   :  { %434 = vrot.lane.b32.xlu1 %v1881_v13, %s1814_s15  ;;  %426 = vrot.lane.b32.xlu0 %v1844_v2, %s1814_s15  ;;  %v469_v54 = vmul.f32 %v2882_v25, %v444_v11  ;;  %v1784_v11 = vld [vmem:[%s4185_s1 + $0x10] sm:$0xff] }
  0x8d   :  { %v2965_v9 = vrot.slane %v1784_v11, %v598_v15 }
  0x8e   :  { %v429_v32 = vpop.permute.xlu1 %428  ;;  %v421_v38 = vpop.permute.xlu0 %420 }
  0x8f   :  { %v448_v30 = vsel %vm194_vm6, %v429_v32, %v405_v31  ;;  %v292_v31 = vadd.f32 %v2042_v59, %v228_v44  ;;  %v436_v62 = vsel %vm194_vm6, %v421_v38, %v429_v32  ;;  %v440_v45 = vsel %vm194_vm6, %v413_v24, %v421_v38  ;;  %v1783_v59 = vld [vmem:[%s4184_s0 + $0x18] sm:$0xff] }
  0x90   :  { %560 = vrot.lane.b32.xlu1 %v2093_v47, %s1815_s22  ;;  %552 = vrot.lane.b32.xlu0 %v2118_v0, %s1815_s22  ;;  %v468_v12 = vmul.f32 %v2885_v58, %v448_v30  ;;  %v519_v32 = vmul.f32 %v1783_v59, %v2901_v14  ;;  %v2960_v44 = vrot.slane %v1929_v27, %v598_v15  ;;  %v1785_v15 = vld [vmem:[%s4184_s0 + $0x8] sm:$0xff]  ;;  %v4316_v59 = vrot.slane %v2118_v0, 1 }
  0x91   :  { %v294_v38 = vadd.f32 %v2005_v48, %v230_v7  ;;  %v388_v24 = vadd.f32 %v372_v18, %v291_v50  ;;  %v389_v61 = vadd.f32 %v373_v10, %v292_v31  ;;  %v471_v30 = vmul.f32 %v2891_v60, %v436_v62 }
  0x92   :  { %v557_v22 = vpop.permute.xlu1 %556  ;;  %v549_v36 = vpop.permute.xlu0 %548  ;;  %v470_v27 = vmul.f32 %v2888_v42, %v440_v45  ;;  %v517_v48 = vmul.f32 %v1785_v15, %v2921_v63  ;;  %v4313_v18 = vrot.slane %v1912_v21, 1  ;;  %v4314_v62 = vrot.slane %v2093_v47, 1 }
  0x93   :  { %v391_v35 = vadd.f32 %v375_v5, %v294_v38  ;;  %v485_v17 = vadd.f32 %v469_v54, %v389_v61  ;;  %v484_v10 = vadd.f32 %v468_v12, %v388_v24  ;;  %v4315_v45 = vrot.slane %v1864_v8, 1  ;;  %v1786_v12 = vld [vmem:[%s4185_s1 + $0x8] sm:$0xff] }
  0x94   :  { %576 = vrot.lane.b32.xlu1 %v2182_v51, %s1815_s22  ;;  %568 = vrot.lane.b32.xlu0 %v2202_v57, %s1815_s22  ;;  %v2985_v7 = vsel %vm660_vm2, %v4314_v62, %v4313_v18  ;;  %v390_v21 = vadd.f32 %v374_v28, %v293_v3  ;;  %v588_v47 = vsel %vm339_vm7, %v549_v36, %v557_v22  ;;  %v4317_v24 = vrot.slane %v1881_v13, 1 }
  0x95   :  { %v2993_v15 = vsel %vm660_vm2, %v4316_v59, %v4315_v45  ;;  %v487_v54 = vadd.f32 %v471_v30, %v391_v35  ;;  %v3010_v28 = vrot.slane %v1786_v12, %v2933_v33  ;;  %v4318_v61 = vrot.slane %v2182_v51, 1 }
  0x96   :  { %v573_v50 = vpop.permute.xlu1 %572  ;;  %v565_v31 = vpop.permute.xlu0 %564  ;;  %v4319_v3 = vrot.slane %v1844_v2, 1  ;;  %v532_v35 = vadd.f32 %v2918_v16, %v484_v10  ;;  %v3047_v16 = vrot.slane %v1784_v11, %v2933_v33 }
  0x97   :  { %v592_v18 = vsel %vm339_vm7, %v573_v50, %v549_v36  ;;  %v584_v5 = vsel %vm339_vm7, %v557_v22, %v565_v31  ;;  %v580_v8 = vsel %vm339_vm7, %v565_v31, %v573_v50  ;;  %v486_v36 = vadd.f32 %v470_v27, %v390_v21  ;;  %v1787_v22 = vld [vmem:[%s4184_s0 + $0x10] sm:$0xff] }
  0x98   :  { %v613_v0 = vmul.f32 %v2960_v44, %v584_v5  ;;  %725 = vrot.lane.b32.xlu1 %v2985_v7, %s1814_s15  ;;  %v518_v38 = vmul.f32 %v1787_v22, %v2924_v29  ;;  %717 = vrot.lane.b32.xlu0 %v2993_v15, %s1814_s15  ;;  %v3024_v30 = vsel %vm660_vm2, %v4318_v61, %v4317_v24  ;;  %v4320_v27 = vrot.slane %v2202_v57, 1 }
  0x99   :  { %v612_v50 = vmul.f32 %v2898_v49, %v588_v47  ;;  %v615_v13 = vmul.f32 %v2904_v1, %v592_v18  ;;  %v533_v31 = vadd.f32 %v517_v48, %v485_v17  ;;  %v614_v59 = vmul.f32 %v2965_v9, %v580_v8  ;;  %v1789_v17 = vld [vmem:[%s4185_s1 + $0x18] sm:$0xff] }
  0x9a   :  { %v3032_v62 = vsel %vm660_vm2, %v4320_v27, %v4319_v3  ;;  %v722_v51 = vpop.permute.xlu1 %721  ;;  %v714_v45 = vpop.permute.xlu0 %713  ;;  %v3044_v57 = vrot.slane %v1788_v4, %v2933_v33  ;;  %v535_v10 = vadd.f32 %v519_v32, %v487_v54  ;;  %v3056_v47 = vrot.slane %v1789_v17, %v2933_v33  ;;  %v1714_v4 = vld [vmem:[%s4185_s1 + $0x28] ss:$0 sm:$0xff] }
  0x9b   :  { %v753_v2 = vsel %vm194_vm6, %v714_v45, %v722_v51  ;;  %v629_v21 = vadd.f32 %v613_v0, %v533_v31  ;;  %v534_v18 = vadd.f32 %v518_v38, %v486_v36  ;;  %v628_v11 = vadd.f32 %v612_v50, %v532_v35  ;;  %v1713_v31 = vld [vmem:[%s4185_s1 + $0x20] ss:$0 sm:$0xff] }
  0x9c   :  { %v778_v48 = vmul.f32 %v3010_v28, %v753_v2  ;;  %741 = vrot.lane.b32.xlu1 %v3024_v30, %s1814_s15  ;;  %733 = vrot.lane.b32.xlu0 %v3032_v62, %s1814_s15  ;;  %v631_v5 = vadd.f32 %v615_v13, %v535_v10  ;;  %v1716_v2 = vld [vmem:[%s4185_s1 + $0x38] ss:$0 sm:$0xff] }
  0x9d   :  { %v630_v0 = vadd.f32 %v614_v59, %v534_v18 }
  0x9e   :  { %v794_v32 = vadd.f32 %v778_v48, %v629_v21  ;;  %v738_v54 = vpop.permute.xlu1 %737  ;;  %v730_v8 = vpop.permute.xlu0 %729 }
  0x9f   :  { %v757_v12 = vsel %vm194_vm6, %v738_v54, %v714_v45  ;;  %v745_v22 = vsel %vm194_vm6, %v730_v8, %v738_v54  ;;  %v749_v33 = vsel %vm194_vm6, %v722_v51, %v730_v8  ;;  %v1791_v54 = vld [vmem:[%s4184_s0 + $0x60] sm:$0xff] }
  0xa0   :  { %v777_v36 = vmul.f32 %v3044_v57, %v757_v12  ;;  %v779_v38 = vmul.f32 %v3047_v16, %v749_v33  ;;  %v780_v24 = vmul.f32 %v3056_v47, %v745_v22  ;;  %867 = vrot.lane.b32.xlu1 %v2315_v6, %s1815_s22  ;;  %v842_v61 = vadd.f32 %v2073_v37, %v794_v32  ;;  %v1790_v32 = vld [vmem:[%s4184_s0 + $0x68] sm:$0xff] }
  0xa1   :  { %859 = vrot.lane.b32.xlu0 %v2331_v26, %s1815_s22 }
  0xa2   :  { %v793_v3 = vadd.f32 %v777_v36, %v628_v11  ;;  %v795_v27 = vadd.f32 %v779_v38, %v630_v0  ;;  %v796_v35 = vadd.f32 %v780_v24, %v631_v5  ;;  %v866_v50 = vpop.permute.xlu1 %865  ;;  %v858_v13 = vpop.permute.xlu0 %857  ;;  %v1792_v24 = vld [vmem:[%s4184_s0 + $0x78] sm:$0xff] }
  0xa3   :  { %v897_v59 = vsel %vm339_vm7, %v858_v13, %v866_v50 }
  0xa4   :  { %883 = vrot.lane.b32.xlu1 %v2347_v23, %s1815_s22  ;;  %v844_v51 = vadd.f32 %v2103_v52, %v796_v35  ;;  %v841_v45 = vadd.f32 %v2077_v40, %v793_v3  ;;  %v843_v37 = vadd.f32 %v2128_v19, %v795_v27  ;;  %v1715_v40 = vld [vmem:[%s4185_s1 + $0x30] ss:$0 sm:$0xff]  ;;  %v921_v17 = vmul.f32 %v1713_v31, %v897_v59 }
  0xa5   :  { %875 = vrot.lane.b32.xlu0 %v2367_v56, %s1815_s22  ;;  %v1143_v27 = vld [vmem:[%s4186_s2 + $0x5f0] sm:$0xff] }
  0xa6   :  { %v882_v52 = vpop.permute.xlu1 %881  ;;  %v874_v19 = vpop.permute.xlu0 %873  ;;  %v3123_v3 = vadd.f32 %v921_v17, %v841_v45  ;;  %v1793_v35 = vld [vmem:[%s4184_s0 + $0x70] sm:$0xff]  ;;  %v4327_v17 = vld [vmem:[#allocation18_spill] sm:$0xff] }
  0xa7   :  { %v901_v10 = vsel %vm339_vm7, %v882_v52, %v858_v13  ;;  %v889_v21 = vsel %vm339_vm7, %v874_v19, %v882_v52  ;;  %v893_v48 = vsel %vm339_vm7, %v866_v50, %v874_v19  ;;  %v1012_v50 = vld [vmem:[%s4186_s2 + $0x1d8] sm:$0xff]  ;;  %v4325_v13 = vld [vmem:[#allocation10_spill] sm:$0xff]  ;;  %v1139_v52 = vld [vmem:[%s4186_s2 + $0x5d0] sm:$0xff] }
  0xa8   :  { %v924_v18 = vmul.f32 %v1716_v2, %v901_v10  ;;  %v922_v11 = vmul.f32 %v1714_v4, %v893_v48  ;;  %v923_v5 = vmul.f32 %v1715_v40, %v889_v21  ;;  %562 = vrot.lane.b32.xlu1 %v1790_v32, %s1815_s22  ;;  %4324 = vst [vmem:[#allocation31_spill] sm:$0xff] %v3123_v3  ;;  %v1011_v40 = vld [vmem:[%s4186_s2 + $0x1d0] sm:$0xff]  ;;  %v4326_v19 = vld [vmem:[#allocation26_spill] sm:$0xff] }
  0xa9   :  { %554 = vrot.lane.b32.xlu0 %v1791_v54, %s1815_s22  ;;  %v1007_v32 = vld [vmem:[%s4186_s2 + $0x1b0] sm:$0xff]  ;;  %v4329_v54 = vld [vmem:[#allocation11_spill] sm:$0xff] }
  0xaa   :  { %v171_v8 = vpop.permute.xlu1 %170  ;;  %v163_v0 = vpop.permute.xlu0 %162  ;;  %v3109_v12 = vadd.f32 %v922_v11, %v842_v61  ;;  %v3111_v22 = vadd.f32 %v924_v18, %v844_v51  ;;  %v3113_v33 = vadd.f32 %v923_v5, %v843_v37  ;;  %v1015_v61 = vld [vmem:[%s4186_s2 + $0x1f0] sm:$0xff]  ;;  %v1140_v37 = vld [vmem:[%s4186_s2 + $0x5d8] sm:$0xff]  ;;  %v4328_v5 = vld [vmem:[#allocation19_spill] sm:$0xff] }
  0xab   :  { %v204_v36 = vsel %vm194_vm6, %v163_v0, %v171_v8  ;;  %v1008_v18 = vld [vmem:[%s4186_s2 + $0x1b8] sm:$0xff] }
  0xac   :  { %4321 = vst [vmem:[#allocation28_spill] sm:$0xff] %v3109_v12  ;;  %4322 = vst [vmem:[#allocation29_spill] sm:$0xff] %v3111_v22  ;;  %v232_v38 = vmul.f32 %v2851_v39, %v204_v36  ;;  %578 = vrot.lane.b32.xlu1 %v1792_v24, %s1815_s22  ;;  %1273 = vmatprep.mubr.f32.mxu0 %v3109_v12  ;;  %v1136_v11 = vld [vmem:[%s4186_s2 + $0x5b8] sm:$0xff] }
  0xad   :  { %4323 = vst [vmem:[#allocation30_spill] sm:$0xff] %v3113_v33  ;;  %1362 = vmatprep.mubr.f32.mxu1 %v3111_v22  ;;  %570 = vrot.lane.b32.xlu0 %v1793_v35, %s1815_s22  ;;  %v1135_v35 = vld [vmem:[%s4186_s2 + $0x5b0] sm:$0xff] }
  0xae   :  { %v3140_v31 = vadd.f32 %v4325_v13, %v232_v38  ;;  %1274 = vmatmul.mubr.f32.vlgmr.msra.gmra.mxu0 %v3123_v3  ;;  %1363 = vmatmul.mubr.f32.vlgmr.msra.gmra.mxu1 %v3113_v33  ;;  %v187_v51 = vpop.permute.xlu1 %186  ;;  %v179_v45 = vpop.permute.xlu0 %178  ;;  %v4331_v38 = vld [vmem:[#allocation12_spill] sm:$0xff]  ;;  %v1004_v13 = vld [vmem:[%s4186_s2 + $0x198] sm:$0xff] }
  0xaf   :  { %v208_v59 = vsel %vm194_vm6, %v187_v51, %v163_v0  ;;  %v196_v2 = vsel %vm194_vm6, %v179_v45, %v187_v51  ;;  %v200_v4 = vsel %vm194_vm6, %v171_v8, %v179_v45  ;;  %1388 = vmatpush1.msra.mxu0 %v1015_v61  ;;  %1477 = vmatpush1.msra.mxu1 %v1143_v27  ;;  %v4330_v0 = vld [vmem:[#allocation13_spill] sm:$0xff]  ;;  %v4371_v53 = vld [vmem:[#allocation31_spill] sm:$0xff] }
  0xb0   :  { %v231_v10 = vmul.f32 %v4326_v19, %v208_v59  ;;  %v233_v21 = vmul.f32 %v2858_v55, %v200_v4  ;;  %v234_v48 = vmul.f32 %v2848_v34, %v196_v2  ;;  %727 = vrot.lane.b32.xlu1 %v4327_v17, %s1814_s15  ;;  %1389 = vmatprep.subr.mxu0 %v1012_v50  ;;  %v1132_v51 = vld [vmem:[%s4186_s2 + $0x598] sm:$0xff]  ;;  %v1003_v59 = vld [vmem:[%s4186_s2 + $0x190] sm:$0xff] }
  0xb1   :  { %719 = vrot.lane.b32.xlu0 %v4328_v5, %s1814_s15  ;;  %1478 = vmatprep.subr.mxu1 %v1140_v37  ;;  %v4332_v37 = vld [vmem:[#allocation20_spill] sm:$0xff]  ;;  %v4333_v4 = vld [vmem:[#allocation21_spill] sm:$0xff] }
  0xb2   :  { %v295_v8 = vadd.f32 %v4329_v54, %v231_v10  ;;  %v297_v36 = vadd.f32 %v4330_v0, %v233_v21  ;;  %v298_v24 = vadd.f32 %v4331_v38, %v234_v48  ;;  %v318_v61 = vpop.permute.xlu1 %317  ;;  %v310_v27 = vpop.permute.xlu0 %309  ;;  %1390 = vmatpush1.msra.mxu0 %v1011_v40  ;;  %1479 = vmatpush1.msra.mxu1 %v1139_v52  ;;  %v1131_v2 = vld [vmem:[%s4186_s2 + $0x590] sm:$0xff]  ;;  %v1000_v40 = vld [vmem:[%s4186_s2 + $0x178] sm:$0xff] }
  0xb3   :  { %v349_v50 = vsel %vm339_vm7, %v310_v27, %v318_v61  ;;  %1391 = vmatprep.subr.mxu0 %v1008_v18  ;;  %1480 = vmatprep.subr.mxu1 %v1136_v11  ;;  %v1128_v48 = vld [vmem:[%s4186_s2 + $0x578] sm:$0xff]  ;;  %v999_v54 = vld [vmem:[%s4186_s2 + $0x170] sm:$0xff] }
  0xb4   :  { %v376_v45 = vmul.f32 %v2861_v46, %v349_v50  ;;  %743 = vrot.lane.b32.xlu1 %v4332_v37, %s1814_s15  ;;  %1392 = vmatpush1.msra.mxu0 %v1007_v32  ;;  %v4334_v50 = vld [vmem:[#allocation22_spill] sm:$0xff] }
  0xb5   :  { %735 = vrot.lane.b32.xlu0 %v4333_v4, %s1814_s15  ;;  %1481 = vmatpush1.msra.mxu1 %v1135_v35  ;;  %v1124_v35 = vld [vmem:[%s4186_s2 + $0x558] sm:$0xff] }
  0xb6   :  { %v3203_v52 = vadd.f32 %v376_v45, %v295_v8  ;;  %v334_v10 = vpop.permute.xlu1 %333  ;;  %v326_v21 = vpop.permute.xlu0 %325  ;;  %1393 = vmatprep.subr.mxu0 %v1004_v13  ;;  %1482 = vmatprep.subr.mxu1 %v1132_v51  ;;  %v1127_v8 = vld [vmem:[%s4186_s2 + $0x570] sm:$0xff]  ;;  %v4335_v13 = vld [vmem:[#allocation5_spill] sm:$0xff] }
  0xb7   :  { %v353_v18 = vsel %vm339_vm7, %v334_v10, %v310_v27  ;;  %v341_v11 = vsel %vm339_vm7, %v326_v21, %v334_v10  ;;  %v345_v32 = vsel %vm339_vm7, %v318_v61, %v326_v21  ;;  %1394 = vmatpush1.msra.mxu0 %v1003_v59  ;;  %1483 = vmatpush1.msra.mxu1 %v1131_v2  ;;  %v996_v61 = vld [vmem:[%s4186_s2 + $0x158] sm:$0xff]  ;;  %v995_v45 = vld [vmem:[%s4186_s2 + $0x150] sm:$0xff] }
  0xb8   :  { %v379_v0 = vmul.f32 %v2864_v43, %v353_v18  ;;  %v377_v38 = vmul.f32 %v2867_v20, %v345_v32  ;;  %v378_v27 = vmul.f32 %v2876_v41, %v341_v11  ;;  %869 = vrot.lane.b32.xlu1 %v2985_v7, %s1815_s22  ;;  %1395 = vmatprep.subr.mxu0 %v1000_v40  ;;  %v1123_v18 = vld [vmem:[%s4186_s2 + $0x550] sm:$0xff] }
  0xb9   :  { %v284_v51 = vmul.f32 %v4335_v13, %v4334_v50  ;;  %861 = vrot.lane.b32.xlu0 %v2993_v15, %s1815_s22  ;;  %1484 = vmatprep.subr.mxu1 %v1128_v48  ;;  %v991_v11 = vld [vmem:[%s4186_s2 + $0x130] sm:$0xff]  ;;  %v4340_v50 = vld [vmem:[#allocation25_spill] sm:$0xff] }
  0xba   :  { %v3238_v59 = vadd.f32 %v379_v0, %v298_v24  ;;  %v3241_v2 = vadd.f32 %v377_v38, %v3140_v31  ;;  %v3243_v40 = vadd.f32 %v378_v27, %v297_v36  ;;  %v173_v10 = vpop.permute.xlu1 %172  ;;  %v165_v21 = vpop.permute.xlu0 %164  ;;  %1396 = vmatpush1.msra.mxu0 %v999_v54  ;;  %1485 = vmatpush1.msra.mxu1 %v1127_v8  ;;  %v992_v31 = vld [vmem:[%s4186_s2 + $0x138] sm:$0xff]  ;;  %v1119_v32 = vld [vmem:[%s4186_s2 + $0x530] sm:$0xff]  ;;  %v4336_v54 = vld [vmem:[#allocation23_spill] sm:$0xff] }
  0xbb   :  { %v205_v48 = vsel %vm194_vm6, %v165_v21, %v173_v10  ;;  %1397 = vmatprep.subr.mxu0 %v996_v61  ;;  %1486 = vmatprep.subr.mxu1 %v1124_v35  ;;  %v1120_v36 = vld [vmem:[%s4186_s2 + $0x538] sm:$0xff]  ;;  %v4337_v8 = vld [vmem:[#allocation3_spill] sm:$0xff]  ;;  %v4338_v27 = vld [vmem:[#allocation24_spill] sm:$0xff] }
  0xbc   :  { %v236_v24 = vmul.f32 %v2851_v39, %v205_v48  ;;  %885 = vrot.lane.b32.xlu1 %v3024_v30, %s1815_s22  ;;  %1398 = vmatpush1.msra.mxu0 %v995_v45  ;;  %v283_v0 = vmul.f32 %v4337_v8, %v4336_v54  ;;  %v988_v38 = vld [vmem:[%s4186_s2 + $0x118] sm:$0xff]  ;;  %v4339_v61 = vld [vmem:[#allocation4_spill] sm:$0xff]  ;;  %v4341_v45 = vld [vmem:[#allocation2_spill] sm:$0xff] }
  0xbd   :  { %877 = vrot.lane.b32.xlu0 %v3032_v62, %s1815_s22  ;;  %1487 = vmatpush1.msra.mxu1 %v1123_v18  ;;  %v286_v35 = vmul.f32 %v4339_v61, %v4338_v27  ;;  %v285_v48 = vmul.f32 %v4341_v45, %v4340_v50  ;;  %v1116_v18 = vld [vmem:[%s4186_s2 + $0x518] sm:$0xff] }
  0xbe   :  { %v3276_v3 = vadd.f32 %v284_v51, %v236_v24  ;;  %v189_v33 = vpop.permute.xlu1 %188  ;;  %v181_v12 = vpop.permute.xlu0 %180  ;;  %1399 = vmatprep.subr.mxu0 %v992_v31  ;;  %1488 = vmatprep.subr.mxu1 %v1120_v36  ;;  %v987_v51 = vld [vmem:[%s4186_s2 + $0x110] sm:$0xff] }
  0xbf   :  { %v209_v54 = vsel %vm194_vm6, %v189_v33, %v165_v21  ;;  %v197_v22 = vsel %vm194_vm6, %v181_v12, %v189_v33  ;;  %v201_v27 = vsel %vm194_vm6, %v173_v10, %v181_v12  ;;  %1400 = vmatpush1.msra.mxu0 %v991_v11  ;;  %1489 = vmatpush1.msra.mxu1 %v1119_v32  ;;  %v1115_v31 = vld [vmem:[%s4186_s2 + $0x510] sm:$0xff]  ;;  %v984_v12 = vld [vmem:[%s4186_s2 + $0xf8] sm:$0xff] }
  0xc0   :  { %v235_v36 = vmul.f32 %v4326_v19, %v209_v54  ;;  %v237_v21 = vmul.f32 %v2858_v55, %v201_v27  ;;  %v238_v24 = vmul.f32 %v2848_v34, %v197_v22  ;;  %871 = vrot.lane.b32.xlu1 %v4327_v17, %s1815_s22  ;;  %1401 = vmatprep.subr.mxu0 %v988_v38  ;;  %v1112_v33 = vld [vmem:[%s4186_s2 + $0x4f8] sm:$0xff]  ;;  %v983_v22 = vld [vmem:[%s4186_s2 + $0xf0] sm:$0xff] }
  0xc1   :  { %863 = vrot.lane.b32.xlu0 %v4328_v5, %s1815_s22  ;;  %1490 = vmatprep.subr.mxu1 %v1116_v18  ;;  %v1111_v54 = vld [vmem:[%s4186_s2 + $0x4f0] sm:$0xff]  ;;  %v4352_v5 = vld [vmem:[#allocation6_spill] sm:$0xff] }
  0xc2   :  { %v3309_v10 = vadd.f32 %v283_v0, %v235_v36  ;;  %v3311_v11 = vadd.f32 %v285_v48, %v237_v21  ;;  %v3313_v32 = vadd.f32 %v286_v35, %v238_v24  ;;  %v415_v38 = vpop.permute.xlu1 %414  ;;  %v407_v50 = vpop.permute.xlu0 %406  ;;  %1402 = vmatpush1.msra.mxu0 %v987_v51  ;;  %1491 = vmatpush1.msra.mxu1 %v1115_v31  ;;  %v980_v0 = vld [vmem:[%s4186_s2 + $0xd8] sm:$0xff]  ;;  %v979_v27 = vld [vmem:[%s4186_s2 + $0xd0] sm:$0xff] }
  0xc3   :  { %v445_v18 = vsel %vm194_vm6, %v407_v50, %v415_v38  ;;  %1403 = vmatprep.subr.mxu0 %v984_v12  ;;  %1492 = vmatprep.subr.mxu1 %v1112_v33  ;;  %v1108_v35 = vld [vmem:[%s4186_s2 + $0x4d8] sm:$0xff]  ;;  %v1107_v51 = vld [vmem:[%s4186_s2 + $0x4d0] sm:$0xff] }
  0xc4   :  { %v473_v48 = vmul.f32 %v2882_v25, %v445_v18  ;;  %887 = vrot.lane.b32.xlu1 %v4332_v37, %s1815_s22  ;;  %1404 = vmatpush1.msra.mxu0 %v983_v22  ;;  %v976_v31 = vld [vmem:[%s4186_s2 + $0xb8] sm:$0xff]  ;;  %v975_v33 = vld [vmem:[%s4186_s2 + $0xb0] sm:$0xff] }
  0xc5   :  { %879 = vrot.lane.b32.xlu0 %v4333_v4, %s1815_s22  ;;  %1493 = vmatpush1.msra.mxu1 %v1111_v54  ;;  %v1104_v12 = vld [vmem:[%s4186_s2 + $0x4b8] sm:$0xff]  ;;  %v1103_v18 = vld [vmem:[%s4186_s2 + $0x4b0] sm:$0xff] }
  0xc6   :  { %v3341_v36 = vadd.f32 %v473_v48, %v3241_v2  ;;  %v431_v21 = vpop.permute.xlu1 %430  ;;  %v423_v24 = vpop.permute.xlu0 %422  ;;  %1405 = vmatprep.subr.mxu0 %v980_v0  ;;  %1494 = vmatprep.subr.mxu1 %v1108_v35  ;;  %v972_v0 = vld [vmem:[%s4186_s2 + $0x98] sm:$0xff]  ;;  %v1147_v17 = vld [vmem:[%s4186_s2 + $0x610] sm:$0xff] }
  0xc7   :  { %v449_v22 = vsel %vm194_vm6, %v431_v21, %v407_v50  ;;  %v437_v54 = vsel %vm194_vm6, %v423_v24, %v431_v21  ;;  %v441_v2 = vsel %vm194_vm6, %v415_v38, %v423_v24  ;;  %1406 = vmatpush1.msra.mxu0 %v979_v27  ;;  %1495 = vmatpush1.msra.mxu1 %v1107_v51  ;;  %v1100_v38 = vld [vmem:[%s4186_s2 + $0x498] sm:$0xff]  ;;  %v971_v27 = vld [vmem:[%s4186_s2 + $0x90] sm:$0xff] }
  0xc8   :  { %v472_v35 = vmul.f32 %v2885_v58, %v449_v22  ;;  %v474_v50 = vmul.f32 %v2888_v42, %v441_v2  ;;  %v475_v48 = vmul.f32 %v2891_v60, %v437_v54  ;;  %1407 = vmatprep.subr.mxu0 %v976_v31  ;;  %1496 = vmatprep.subr.mxu1 %v1104_v12  ;;  %v1099_v51 = vld [vmem:[%s4186_s2 + $0x490] sm:$0xff]  ;;  %v968_v12 = vld [vmem:[%s4186_s2 + $0x78] sm:$0xff] }
  0xc9   :  { %1408 = vmatpush1.msra.mxu0 %v975_v33  ;;  %1497 = vmatpush1.msra.mxu1 %v1103_v18  ;;  %v1096_v33 = vld [vmem:[%s4186_s2 + $0x478] sm:$0xff] }
  0xca   :  { %v3374_v21 = vadd.f32 %v472_v35, %v3203_v52  ;;  %v3377_v24 = vadd.f32 %v474_v50, %v3243_v40  ;;  %v3380_v31 = vadd.f32 %v475_v48, %v3238_v59  ;;  %v320_v22 = vpop.permute.xlu1 %319  ;;  %v312_v54 = vpop.permute.xlu0 %311  ;;  %1409 = vmatprep.subr.mxu0 %v972_v0  ;;  %1498 = vmatprep.subr.mxu1 %v1100_v38  ;;  %v967_v59 = vld [vmem:[%s4186_s2 + $0x70] sm:$0xff]  ;;  %v964_v18 = vld [vmem:[%s4186_s2 + $0x58] sm:$0xff] }
  0xcb   :  { %v350_v52 = vsel %vm339_vm7, %v312_v54, %v320_v22  ;;  %1410 = vmatpush1.msra.mxu0 %v971_v27  ;;  %v1095_v40 = vld [vmem:[%s4186_s2 + $0x470] sm:$0xff]  ;;  %1499 = vmatpush1.msra.mxu1 %v1099_v51  ;;  %v1092_v0 = vld [vmem:[%s4186_s2 + $0x458] sm:$0xff] }
  0xcc   :  { %v380_v2 = vmul.f32 %v2861_v46, %v350_v52  ;;  %1411 = vmatprep.subr.mxu0 %v968_v12  ;;  %1500 = vmatprep.subr.mxu1 %v1096_v33  ;;  %v963_v35 = vld [vmem:[%s4186_s2 + $0x50] sm:$0xff]  ;;  %v960_v51 = vld [vmem:[%s4186_s2 + $0x38] sm:$0xff] }
  0xcd   :  { %v1091_v50 = vld [vmem:[%s4186_s2 + $0x450] sm:$0xff]  ;;  %1412 = vmatpush1.msra.mxu0 %v967_v59  ;;  %1501 = vmatpush1.msra.mxu1 %v1095_v40  ;;  %v1088_v12 = vld [vmem:[%s4186_s2 + $0x438] sm:$0xff] }
  0xce   :  { %v3410_v48 = vadd.f32 %v380_v2, %v3309_v10  ;;  %v336_v38 = vpop.permute.xlu1 %335  ;;  %v328_v27 = vpop.permute.xlu0 %327  ;;  %1413 = vmatprep.subr.mxu0 %v964_v18  ;;  %1502 = vmatprep.subr.mxu1 %v1092_v0  ;;  %v959_v59 = vld [vmem:[%s4186_s2 + $0x30] sm:$0xff]  ;;  %v1084_v18 = vld [vmem:[%s4186_s2 + $0x418] sm:$0xff]  ;;  %v4342_v0 = vld [vmem:[#allocation14_spill] sm:$0xff] }
  0xcf   :  { %v354_v33 = vsel %vm339_vm7, %v336_v38, %v312_v54  ;;  %v342_v52 = vsel %vm339_vm7, %v328_v27, %v336_v38  ;;  %v346_v10 = vsel %vm339_vm7, %v320_v22, %v328_v27  ;;  %v1087_v40 = vld [vmem:[%s4186_s2 + $0x430] sm:$0xff]  ;;  %1414 = vmatpush1.msra.mxu0 %v963_v35  ;;  %1503 = vmatpush1.msra.mxu1 %v1091_v50  ;;  %v956_v22 = vld [vmem:[%s4186_s2 + $0x18] sm:$0xff] }
  0xd0   :  { %v383_v2 = vmul.f32 %v2864_v43, %v354_v33  ;;  %v381_v54 = vmul.f32 %v2867_v20, %v346_v10  ;;  %v382_v4 = vmul.f32 %v2876_v41, %v342_v52  ;;  %v288_v38 = vmul.f32 %v4335_v13, %v4342_v0  ;;  %1415 = vmatprep.subr.mxu0 %v960_v51  ;;  %v955_v27 = vld [vmem:[%s4186_s2 + $0x10] sm:$0xff]  ;;  %v1208_v10 = vld [vmem:[%s4186_s2 + $0x7f8] sm:$0xff] }
  0xd1   :  { %1504 = vmatprep.subr.mxu1 %v1088_v12  ;;  %v1083_v35 = vld [vmem:[%s4186_s2 + $0x410] sm:$0xff]  ;;  %1416 = vmatpush1.msra.mxu0 %v959_v59  ;;  %v1080_v12 = vld [vmem:[%s4186_s2 + $0x3f8] sm:$0xff] }
  0xd2   :  { %v3448_v50 = vadd.f32 %v383_v2, %v3313_v32  ;;  %v3451_v33 = vadd.f32 %v381_v54, %v3276_v3  ;;  %v3454_v52 = vadd.f32 %v382_v4, %v3311_v11  ;;  %v175_v13 = vpop.permute.xlu1 %174  ;;  %v167_v51 = vpop.permute.xlu0 %166  ;;  %1505 = vmatpush1.msra.mxu1 %v1087_v40  ;;  %1417 = vmatprep.subr.mxu0 %v956_v22  ;;  %v1079_v3 = vld [vmem:[%s4186_s2 + $0x3f0] sm:$0xff]  ;;  %v1076_v59 = vld [vmem:[%s4186_s2 + $0x3d8] sm:$0xff]  ;;  %v4343_v2 = vld [vmem:[#allocation15_spill] sm:$0xff] }
  0xd3   :  { %v206_v32 = vsel %vm194_vm6, %v167_v51, %v175_v13  ;;  %1506 = vmatprep.subr.mxu1 %v1084_v18  ;;  %v1207_v4 = vld [vmem:[%s4186_s2 + $0x7f0] sm:$0xff]  ;;  %1418 = vmatpush1.msra.mxu0 %v955_v27  ;;  %v1204_v40 = vld [vmem:[%s4186_s2 + $0x7d8] sm:$0xff]  ;;  %v287_v54 = vmul.f32 %v4337_v8, %v4343_v2 }
  0xd4   :  { %v240_v11 = vmul.f32 %v2851_v39, %v206_v32  ;;  %1507 = vmatpush1.msra.mxu1 %v1083_v35  ;;  %1419 = vmatprep.subr.mxu0 %v1080_v12  ;;  %v1075_v22 = vld [vmem:[%s4186_s2 + $0x3d0] sm:$0xff]  ;;  %v4345_v27 = vld [vmem:[#allocation17_spill] sm:$0xff] }
  0xd5   :  { %1508 = vmatprep.subr.mxu1 %v1208_v10  ;;  %v1203_v39 = vld [vmem:[%s4186_s2 + $0x7d0] sm:$0xff]  ;;  %v289_v35 = vmul.f32 %v4341_v45, %v4345_v27  ;;  %1420 = vmatpush2.msra.mxu0 %v1079_v3  ;;  %v1072_v12 = vld [vmem:[%s4186_s2 + $0x3b8] sm:$0xff] }
  0xd6   :  { %v4344_v18 = vld [vmem:[#allocation16_spill] sm:$0xff]  ;;  %v3489_v32 = vadd.f32 %v288_v38, %v240_v11  ;;  %v191_v37 = vpop.permute.xlu1 %190  ;;  %v183_v8 = vpop.permute.xlu0 %182  ;;  %1509 = vmatpush2.msra.mxu1 %v1207_v4  ;;  %v1200_v10 = vld [vmem:[%s4186_s2 + $0x7b8] sm:$0xff]  ;;  %1421 = vmatprep.subr.mxu0 %v1076_v59 }
  0xd7   :  { %v290_v0 = vmul.f32 %v4339_v61, %v4344_v18  ;;  %v210_v61 = vsel %vm194_vm6, %v191_v37, %v167_v51  ;;  %v198_v45 = vsel %vm194_vm6, %v183_v8, %v191_v37  ;;  %v202_v38 = vsel %vm194_vm6, %v175_v13, %v183_v8  ;;  %1510 = vmatprep.subr.mxu1 %v1204_v40  ;;  %v1071_v3 = vld [vmem:[%s4186_s2 + $0x3b0] sm:$0xff]  ;;  %v1068_v37 = vld [vmem:[%s4186_s2 + $0x398] sm:$0xff] }
  0xd8   :  { %v1199_v4 = vld [vmem:[%s4186_s2 + $0x7b0] sm:$0xff]  ;;  %v239_v11 = vmul.f32 %v4326_v19, %v210_v61  ;;  %v241_v51 = vmul.f32 %v2858_v55, %v202_v38  ;;  %v242_v2 = vmul.f32 %v2848_v34, %v198_v45  ;;  %1422 = vmatpush2.msra.mxu0 %v1075_v22  ;;  %1511 = vmatpush2.msra.mxu1 %v1203_v39  ;;  %v1196_v13 = vld [vmem:[%s4186_s2 + $0x798] sm:$0xff] }
  0xd9   :  { %1423 = vmatprep.subr.mxu0 %v1072_v12  ;;  %1512 = vmatprep.subr.mxu1 %v1200_v10  ;;  %v1067_v19 = vld [vmem:[%s4186_s2 + $0x390] sm:$0xff]  ;;  %v1064_v18 = vld [vmem:[%s4186_s2 + $0x378] sm:$0xff] }
  0xda   :  { %v1195_v55 = vld [vmem:[%s4186_s2 + $0x790] sm:$0xff]  ;;  %v3524_v34 = vadd.f32 %v287_v54, %v239_v11  ;;  %v3526_v59 = vadd.f32 %v289_v35, %v241_v51  ;;  %v3528_v40 = vadd.f32 %v290_v0, %v242_v2  ;;  %v417_v22 = vpop.permute.xlu1 %416  ;;  %v409_v39 = vpop.permute.xlu0 %408  ;;  %1424 = vmatpush2.msra.mxu0 %v1071_v3  ;;  %1513 = vmatpush2.msra.mxu1 %v1199_v4  ;;  %v1192_v27 = vld [vmem:[%s4186_s2 + $0x778] sm:$0xff] }
  0xdb   :  { %v446_v54 = vsel %vm194_vm6, %v409_v39, %v417_v22  ;;  %1425 = vmatprep.subr.mxu0 %v1068_v37  ;;  %1514 = vmatprep.subr.mxu1 %v1196_v13  ;;  %v1063_v0 = vld [vmem:[%s4186_s2 + $0x370] sm:$0xff]  ;;  %v1060_v12 = vld [vmem:[%s4186_s2 + $0x358] sm:$0xff] }
  0xdc   :  { %4346 = vst [vmem:[#allocation10_spill] sm:$0xff] %v3526_v59  ;;  %4347 = vst [vmem:[#allocation26_spill] sm:$0xff] %v3528_v40  ;;  %v1191_v35 = vld [vmem:[%s4186_s2 + $0x770] sm:$0xff]  ;;  %v477_v8 = vmul.f32 %v2882_v25, %v446_v54  ;;  %1426 = vmatpush2.msra.mxu0 %v1067_v19  ;;  %1515 = vmatpush2.msra.mxu1 %v1195_v55  ;;  %v1188_v10 = vld [vmem:[%s4186_s2 + $0x758] sm:$0xff] }
  0xdd   :  { %1427 = vmatprep.subr.mxu0 %v1064_v18  ;;  %1516 = vmatprep.subr.mxu1 %v1192_v27  ;;  %v1059_v61 = vld [vmem:[%s4186_s2 + $0x350] sm:$0xff]  ;;  %v1056_v11 = vld [vmem:[%s4186_s2 + $0x338] sm:$0xff] }
  0xde   :  { %v3555_v45 = vadd.f32 %v477_v8, %v3451_v33  ;;  %v433_v38 = vpop.permute.xlu1 %432  ;;  %v425_v3 = vpop.permute.xlu0 %424  ;;  %1428 = vmatpush2.msra.mxu0 %v1063_v0  ;;  %1517 = vmatpush2.msra.mxu1 %v1191_v35  ;;  %v1187_v4 = vld [vmem:[%s4186_s2 + $0x750] sm:$0xff]  ;;  %v1184_v37 = vld [vmem:[%s4186_s2 + $0x738] sm:$0xff] }
  0xdf   :  { %v450_v51 = vsel %vm194_vm6, %v433_v38, %v409_v39  ;;  %v438_v2 = vsel %vm194_vm6, %v425_v3, %v433_v38  ;;  %v442_v33 = vsel %vm194_vm6, %v417_v22, %v425_v3  ;;  %1429 = vmatprep.subr.mxu0 %v1060_v12  ;;  %1518 = vmatprep.subr.mxu1 %v1188_v10  ;;  %v1055_v13 = vld [vmem:[%s4186_s2 + $0x330] sm:$0xff]  ;;  %v1052_v18 = vld [vmem:[%s4186_s2 + $0x318] sm:$0xff] }
  0xe0   :  { %v476_v19 = vmul.f32 %v2885_v58, %v450_v51  ;;  %v478_v55 = vmul.f32 %v2888_v42, %v442_v33  ;;  %v479_v39 = vmul.f32 %v2891_v60, %v438_v2  ;;  %1430 = vmatpush2.msra.mxu0 %v1059_v61  ;;  %v1183_v22 = vld [vmem:[%s4186_s2 + $0x730] sm:$0xff]  ;;  %1519 = vmatpush2.msra.mxu1 %v1187_v4  ;;  %v1180_v27 = vld [vmem:[%s4186_s2 + $0x718] sm:$0xff] }
  0xe1   :  { %1431 = vmatprep.subr.mxu0 %v1056_v11  ;;  %1520 = vmatprep.subr.mxu1 %v1184_v37  ;;  %v1051_v10 = vld [vmem:[%s4186_s2 + $0x310] sm:$0xff]  ;;  %v1044_v3 = vld [vmem:[%s4186_s2 + $0x2d8] sm:$0xff] }
  0xe2   :  { %v3588_v54 = vadd.f32 %v476_v19, %v3410_v48  ;;  %v3591_v0 = vadd.f32 %v478_v55, %v3454_v52  ;;  %v3594_v35 = vadd.f32 %v479_v39, %v3448_v50  ;;  %v3596_v8 = vpop.permute.xlu1 %558  ;;  %v3598_v12 = vpop.permute.xlu0 %550  ;;  %1432 = vmatpush2.msra.mxu0 %v1055_v13  ;;  %v1179_v48 = vld [vmem:[%s4186_s2 + $0x710] sm:$0xff]  ;;  %1521 = vmatpush2.msra.mxu1 %v1183_v22  ;;  %v1048_v50 = vld [vmem:[%s4186_s2 + $0x2f8] sm:$0xff] }
  0xe3   :  { %1433 = vmatprep.subr.mxu0 %v1052_v18  ;;  %v1176_v52 = vld [vmem:[%s4186_s2 + $0x6f8] sm:$0xff]  ;;  %1522 = vmatprep.subr.mxu1 %v1180_v27  ;;  %v1047_v61 = vld [vmem:[%s4186_s2 + $0x2f0] sm:$0xff] }
  0xe4   :  { %v1175_v38 = vld [vmem:[%s4186_s2 + $0x6f0] sm:$0xff]  ;;  %1434 = vmatpush2.msra.mxu0 %v1051_v10  ;;  %1523 = vmatpush2.msra.mxu1 %v1179_v48  ;;  %v1172_v4 = vld [vmem:[%s4186_s2 + $0x6d8] sm:$0xff] }
  0xe5   :  { %1435 = vmatprep.subr.mxu0 %v1048_v50  ;;  %1524 = vmatprep.subr.mxu1 %v1176_v52  ;;  %v1043_v2 = vld [vmem:[%s4186_s2 + $0x2d0] sm:$0xff]  ;;  %v1040_v37 = vld [vmem:[%s4186_s2 + $0x2b8] sm:$0xff] }
  0xe6   :  { %v3624_v11 = vpop.permute.xlu1 %574  ;;  %v3626_v51 = vpop.permute.xlu0 %566  ;;  %v1171_v33 = vld [vmem:[%s4186_s2 + $0x6d0] sm:$0xff]  ;;  %1436 = vmatpush2.msra.mxu0 %v1047_v61  ;;  %1525 = vmatpush2.msra.mxu1 %v1175_v38  ;;  %v1168_v13 = vld [vmem:[%s4186_s2 + $0x6b8] sm:$0xff] }
  0xe7   :  { %1437 = vmatprep.subr.mxu0 %v1044_v3  ;;  %1526 = vmatprep.subr.mxu1 %v1172_v4  ;;  %v1039_v19 = vld [vmem:[%s4186_s2 + $0x2b0] sm:$0xff]  ;;  %v1036_v39 = vld [vmem:[%s4186_s2 + $0x298] sm:$0xff] }
  0xe8   :  { %v1167_v55 = vld [vmem:[%s4186_s2 + $0x6b0] sm:$0xff]  ;;  %1438 = vmatpush2.msra.mxu0 %v1043_v2  ;;  %1527 = vmatpush2.msra.mxu1 %v1171_v33  ;;  %v1164_v22 = vld [vmem:[%s4186_s2 + $0x698] sm:$0xff]  ;;  %v585_v33 = vsel %vm339_vm7, %v3596_v8, %v3626_v51 }
  0xe9   :  { %1439 = vmatprep.subr.mxu0 %v1040_v37  ;;  %1528 = vmatprep.subr.mxu1 %v1168_v13  ;;  %v1035_v10 = vld [vmem:[%s4186_s2 + $0x290] sm:$0xff]  ;;  %v1032_v52 = vld [vmem:[%s4186_s2 + $0x278] sm:$0xff] }
  0xea   :  { %v322_v18 = vpop.permute.xlu1 %321  ;;  %v3652_v27 = vpop.permute.xlu0 %313  ;;  %v1163_v48 = vld [vmem:[%s4186_s2 + $0x690] sm:$0xff]  ;;  %1440 = vmatpush2.msra.mxu0 %v1039_v19  ;;  %1529 = vmatpush2.msra.mxu1 %v1167_v55  ;;  %v1160_v61 = vld [vmem:[%s4186_s2 + $0x678] sm:$0xff] }
  0xeb   :  { %v351_v50 = vsel %vm339_vm7, %v3652_v27, %v322_v18  ;;  %1441 = vmatprep.subr.mxu0 %v1036_v39  ;;  %1530 = vmatprep.subr.mxu1 %v1164_v22  ;;  %v1031_v3 = vld [vmem:[%s4186_s2 + $0x270] sm:$0xff]  ;;  %v1028_v2 = vld [vmem:[%s4186_s2 + $0x258] sm:$0xff]  ;;  %v3702_v22 = vld [vmem:[%s4184_s0 + $0x28] sm:$0xff] }
  0xec   :  { %v384_v38 = vmul.f32 %v2861_v46, %v351_v50  ;;  %v1159_v4 = vld [vmem:[%s4186_s2 + $0x670] sm:$0xff]  ;;  %1442 = vmatpush2.msra.mxu0 %v1035_v10  ;;  %1531 = vmatpush2.msra.mxu1 %v1163_v48  ;;  %v1156_v46 = vld [vmem:[%s4186_s2 + $0x658] sm:$0xff]  ;;  %4349 = vst [vmem:[#allocation13_spill] sm:$0xff] %v3702_v22 }
  0xed   :  { %1443 = vmatprep.subr.mxu0 %v1032_v52  ;;  %1532 = vmatprep.subr.mxu1 %v1160_v61  ;;  %v1027_v55 = vld [vmem:[%s4186_s2 + $0x250] sm:$0xff]  ;;  %v1024_v48 = vld [vmem:[%s4186_s2 + $0x238] sm:$0xff]  ;;  %v3718_v52 = vld [vmem:[%s4184_s0 + $0x20] sm:$0xff] }
  0xee   :  { %v3687_v37 = vadd.f32 %v384_v38, %v3524_v34  ;;  %v3689_v13 = vpop.permute.xlu1 %337  ;;  %v3691_v19 = vpop.permute.xlu0 %329  ;;  %v1155_v39 = vld [vmem:[%s4186_s2 + $0x650] sm:$0xff]  ;;  %v521_v34 = vmul.f32 %v3702_v22, %v2921_v63  ;;  %1444 = vmatpush2.msra.mxu0 %v1031_v3  ;;  %1533 = vmatpush2.msra.mxu1 %v1159_v4  ;;  %v1152_v50 = vld [vmem:[%s4186_s2 + $0x638] sm:$0xff]  ;;  %4350 = vst [vmem:[#allocation12_spill] sm:$0xff] %v3718_v52  ;;  %v4351_v61 = vld [vmem:[#allocation27_spill] sm:$0xff] }
  0xef   :  { %v347_v10 = vsel %vm339_vm7, %v322_v18, %v3691_v19  ;;  %v520_v38 = vmul.f32 %v3718_v52, %v4351_v61  ;;  %v589_v18 = vsel %vm339_vm7, %v3598_v12, %v3596_v8  ;;  %1445 = vmatprep.subr.mxu0 %v1028_v2  ;;  %1534 = vmatprep.subr.mxu1 %v1156_v46  ;;  %v1023_v4 = vld [vmem:[%s4186_s2 + $0x230] sm:$0xff]  ;;  %v1020_v2 = vld [vmem:[%s4186_s2 + $0x218] sm:$0xff] }
  0xf0   :  { %4348 = vst [vmem:[#allocation11_spill] sm:$0xff] %v3687_v37  ;;  %v385_v3 = vmul.f32 %v2867_v20, %v347_v10  ;;  %v1151_v22 = vld [vmem:[%s4186_s2 + $0x630] sm:$0xff]  ;;  %v830_v52 = vmul.f32 %v4352_v5, %v2315_v6  ;;  %v593_v8 = vsel %vm339_vm7, %v3624_v11, %v3598_v12  ;;  %v617_v20 = vmul.f32 %v2960_v44, %v585_v33  ;;  %v1148_v46 = vld [vmem:[%s4186_s2 + $0x618] sm:$0xff] }
  0xf1   :  { %1446 = vmatpush2.msra.mxu0 %v1027_v55  ;;  %1535 = vmatpush2.msra.mxu1 %v1155_v39  ;;  %v3749_v6 = vld [vmem:[%s4184_s0 + $0x38] sm:$0xff]  ;;  %v581_v33 = vsel %vm339_vm7, %v3626_v51, %v3624_v11  ;;  %v1019_v10 = vld [vmem:[%s4186_s2 + $0x210] sm:$0xff]  ;;  %v537_v51 = vadd.f32 %v521_v34, %v3341_v36  ;;  %v4355_v36 = vld [vmem:[#allocation7_spill] sm:$0xff] }
  0xf2   :  { %4353 = vst [vmem:[#allocation22_spill] sm:$0xff] %v3749_v6  ;;  %v523_v12 = vmul.f32 %v3749_v6, %v2901_v14  ;;  %v3758_v55 = vadd.f32 %v385_v3, %v3489_v32  ;;  %v724_v39 = vpop.permute.xlu1 %723  ;;  %1447 = vmatprep.subr.mxu0 %v1024_v48  ;;  %1536 = vmatprep.subr.mxu1 %v1152_v50  ;;  %v3770_v11 = vld [vmem:[%s4184_s0 + $0x30] sm:$0xff]  ;;  %v716_v48 = vpop.permute.xlu0 %715 }
  0xf3   :  { %v616_v6 = vmul.f32 %v2898_v49, %v589_v18  ;;  %4354 = vst [vmem:[#allocation5_spill] sm:$0xff] %v3770_v11  ;;  %v522_v32 = vmul.f32 %v3770_v11, %v2924_v29  ;;  %1448 = vmatpush2.msra.mxu0 %v1023_v4  ;;  %1537 = vmatpush2.msra.mxu1 %v1151_v22  ;;  %v4356_v22 = vld [vmem:[#allocation8_spill] sm:$0xff] }
  0xf4   :  { %v536_v50 = vadd.f32 %v520_v38, %v3374_v21  ;;  %v619_v3 = vmul.f32 %v2904_v1, %v593_v8  ;;  %v754_v18 = vsel %vm194_vm6, %v716_v48, %v724_v39  ;;  %1449 = vmatprep.subr.mxu0 %v1020_v2  ;;  %1538 = vmatprep.subr.mxu1 %v1148_v46  ;;  %v4357_v38 = vld [vmem:[#allocation9_spill] sm:$0xff] }
  0xf5   :  { %v618_v37 = vmul.f32 %v2965_v9, %v581_v33  ;;  %v633_v59 = vadd.f32 %v617_v20, %v537_v51  ;;  %v782_v40 = vmul.f32 %v3010_v28, %v754_v18  ;;  %1450 = vmatpush2.msra.mxu0 %v1019_v10  ;;  %1539 = vmatpush2.msra.mxu1 %v1147_v17 }
  0xf6   :  { %v829_v34 = vmul.f32 %v4355_v36, %v2331_v26  ;;  %v832_v21 = vmul.f32 %v4356_v22, %v2347_v23  ;;  %v831_v4 = vmul.f32 %v4357_v38, %v2367_v56  ;;  %v539_v8 = vadd.f32 %v523_v12, %v3380_v31  ;;  %v740_v2 = vpop.permute.xlu1 %739  ;;  %v732_v17 = vpop.permute.xlu0 %731 }
  0xf7   :  { %v632_v46 = vadd.f32 %v616_v6, %v536_v50  ;;  %v538_v33 = vadd.f32 %v522_v32, %v3377_v24  ;;  %v798_v20 = vadd.f32 %v782_v40, %v633_v59  ;;  %v758_v10 = vsel %vm194_vm6, %v740_v2, %v716_v48 }
  0xf8   :  { %v635_v51 = vadd.f32 %v619_v3, %v539_v8  ;;  %v781_v26 = vmul.f32 %v3044_v57, %v758_v10  ;;  %v746_v23 = vsel %vm194_vm6, %v732_v17, %v740_v2  ;;  %v750_v56 = vsel %vm194_vm6, %v724_v39, %v732_v17  ;;  %v3828_v10 = vld [vmem:[%s4184_s0 + $0x40] sm:$0xff] }
  0xf9   :  { %v634_v18 = vadd.f32 %v618_v37, %v538_v33  ;;  %v783_v31 = vmul.f32 %v3047_v16, %v750_v56  ;;  %v784_v6 = vmul.f32 %v3056_v47, %v746_v23  ;;  %v3798_v24 = vadd.f32 %v830_v52, %v798_v20  ;;  %v3838_v23 = vld [vmem:[%s4184_s0 + $0x58] sm:$0xff] }
  0xfa   :  { %v797_v59 = vadd.f32 %v781_v26, %v632_v46  ;;  %v3800_v40 = vpop.permute.xlu1 %418  ;;  %v3802_v48 = vpop.permute.xlu0 %410  ;;  %v3817_v46 = vld [vmem:[%s4184_s0 + $0x48] sm:$0xff]  ;;  %v524_v17 = vmul.f32 %v3828_v10, %v4351_v61  ;;  %4359 = vst [vmem:[#allocation3_spill] sm:$0xff] %v3838_v23  ;;  %v527_v56 = vmul.f32 %v3838_v23, %v2901_v14 }
  0xfb   :  { %v799_v12 = vadd.f32 %v783_v31, %v634_v18  ;;  %v800_v32 = vadd.f32 %v784_v6, %v635_v51  ;;  %4358 = vst [vmem:[#allocation23_spill] sm:$0xff] %v3817_v46 }
  0xfc   :  { %v3804_v50 = vadd.f32 %v829_v34, %v797_v59  ;;  %v525_v34 = vmul.f32 %v3817_v46, %v2921_v63  ;;  %v3848_v59 = vld [vmem:[%s4184_s0 + $0x50] sm:$0xff] }
  0xfd   :  { %v3806_v3 = vadd.f32 %v832_v21, %v800_v32  ;;  %v3808_v8 = vadd.f32 %v831_v4, %v799_v12  ;;  %4360 = vst [vmem:[#allocation24_spill] sm:$0xff] %v3848_v59  ;;  %v526_v12 = vmul.f32 %v3848_v59, %v2924_v29  ;;  %v833_v59 = vmul.f32 %v4355_v36, %v2993_v15 }
  0xfe   :  { %v3810_v37 = vpop.permute.xlu1 %434  ;;  %v3812_v39 = vpop.permute.xlu0 %426  ;;  %v541_v32 = vadd.f32 %v525_v34, %v3555_v45  ;;  %v836_v45 = vmul.f32 %v4356_v22, %v3024_v30  ;;  %v543_v34 = vadd.f32 %v527_v56, %v3594_v35 }
 0x102   :  { %v561_v2 = vpop.permute.xlu1 %560  ;;  %v553_v52 = vpop.permute.xlu0 %552 }
 0x103   :  { %v590_v21 = vsel %vm339_vm7, %v553_v52, %v561_v2 }
 0x104   :  { %v620_v6 = vmul.f32 %v2898_v49, %v590_v21 }
 0x106   :  { %v577_v33 = vpop.permute.xlu1 %576  ;;  %v569_v20 = vpop.permute.xlu0 %568 }
 0x107   :  { %v586_v4 = vsel %vm339_vm7, %v561_v2, %v569_v20  ;;  %v594_v51 = vsel %vm339_vm7, %v577_v33, %v553_v52  ;;  %v582_v18 = vsel %vm339_vm7, %v569_v20, %v577_v33  ;;  %v834_v52 = vmul.f32 %v4352_v5, %v2985_v7 }
 0x108   :  { %v621_v26 = vmul.f32 %v2960_v44, %v586_v4  ;;  %v623_v4 = vmul.f32 %v2904_v1, %v594_v51  ;;  %v540_v20 = vadd.f32 %v524_v17, %v3588_v54  ;;  %v622_v21 = vmul.f32 %v2965_v9, %v582_v18 }
 0x109   :  { %v835_v7 = vmul.f32 %v4357_v38, %v3032_v62  ;;  %v542_v54 = vadd.f32 %v526_v12, %v3591_v0 }
 0x10a   :  { %v726_v31 = vpop.permute.xlu1 %725  ;;  %v718_v2 = vpop.permute.xlu0 %717  ;;  %v637_v23 = vadd.f32 %v621_v26, %v541_v32  ;;  %v636_v46 = vadd.f32 %v620_v6, %v540_v20  ;;  %v639_v32 = vadd.f32 %v623_v4, %v543_v34 }
 0x10b   :  { %v755_v33 = vsel %vm194_vm6, %v718_v2, %v726_v31 }
 0x10c   :  { %v786_v11 = vmul.f32 %v3010_v28, %v755_v33  ;;  %v638_v33 = vadd.f32 %v622_v21, %v542_v54 }
 0x10e   :  { %v742_v51 = vpop.permute.xlu1 %741  ;;  %v802_v17 = vadd.f32 %v786_v11, %v637_v23  ;;  %v734_v18 = vpop.permute.xlu0 %733 }
 0x10f   :  { %v759_v26 = vsel %vm194_vm6, %v742_v51, %v718_v2  ;;  %v747_v30 = vsel %vm194_vm6, %v734_v18, %v742_v51  ;;  %v751_v62 = vsel %vm194_vm6, %v726_v31, %v734_v18  ;;  %v355_v18 = vsel %vm339_vm7, %v3689_v13, %v3652_v27 }
 0x110   :  { %v785_v15 = vmul.f32 %v3044_v57, %v759_v26  ;;  %v787_v35 = vmul.f32 %v3047_v16, %v751_v62  ;;  %v788_v56 = vmul.f32 %v3056_v47, %v747_v30  ;;  %v3878_v0 = vadd.f32 %v834_v52, %v802_v17  ;;  %v3923_v30 = vld [vmem:[%s4185_s1 + $0x30] ss:$0 sm:$0xff] }
 0x111   :  { %v447_v52 = vsel %vm194_vm6, %v3802_v48, %v3800_v40  ;;  %v451_v27 = vsel %vm194_vm6, %v3810_v37, %v3802_v48  ;;  %v443_v48 = vsel %vm194_vm6, %v3800_v40, %v3812_v39 }
 0x112   :  { %v801_v11 = vadd.f32 %v785_v15, %v636_v46  ;;  %v868_v23 = vpop.permute.xlu1 %867  ;;  %v803_v6 = vadd.f32 %v787_v35, %v638_v33  ;;  %v804_v12 = vadd.f32 %v788_v56, %v639_v32  ;;  %v3917_v32 = vld [vmem:[%s4185_s1 + $0x28] ss:$0 sm:$0xff]  ;;  %v343_v33 = vsel %vm339_vm7, %v3691_v19, %v3689_v13 }
 0x113   :  { %v860_v2 = vpop.permute.xlu0 %859  ;;  %v387_v19 = vmul.f32 %v2864_v43, %v355_v18 }
 0x114   :  { %v3880_v4 = vadd.f32 %v833_v59, %v801_v11  ;;  %v898_v20 = vsel %vm339_vm7, %v860_v2, %v868_v23  ;;  %v3884_v34 = vadd.f32 %v836_v45, %v804_v12  ;;  %v3886_v31 = vadd.f32 %v835_v7, %v803_v6  ;;  %v3897_v59 = vld [vmem:[%s4185_s1 + $0x20] ss:$0 sm:$0xff]  ;;  %v3903_v7 = vld [vmem:[%s4185_s1 + $0x38] ss:$0 sm:$0xff] }
 0x115   :  { %v925_v45 = vmul.f32 %v3897_v59, %v898_v20  ;;  %v481_v11 = vmul.f32 %v2882_v25, %v447_v52 }
 0x116   :  { %v884_v21 = vpop.permute.xlu1 %883 }
 0x117   :  { %v902_v46 = vsel %vm339_vm7, %v884_v21, %v860_v2  ;;  %v876_v51 = vpop.permute.xlu0 %875  ;;  %v3955_v25 = vadd.f32 %v925_v45, %v3804_v50  ;;  %v497_v40 = vadd.f32 %v481_v11, %v3758_v55  ;;  %v3968_v50 = vld [vmem:[%s4184_s0 + $0x68] sm:$0xff]  ;;  %v4364_v11 = vld [vmem:[#allocation18_spill] sm:$0xff] }
 0x118   :  { %v928_v54 = vmul.f32 %v3903_v7, %v902_v46  ;;  %v890_v17 = vsel %vm339_vm7, %v876_v51, %v884_v21  ;;  %v894_v26 = vsel %vm339_vm7, %v868_v23, %v876_v51  ;;  %v439_v23 = vsel %vm194_vm6, %v3812_v39, %v3810_v37  ;;  %v4361_v39 = vld [vmem:[#allocation26_spill] sm:$0xff] }
 0x119   :  { %v926_v15 = vmul.f32 %v3917_v32, %v894_v26  ;;  %v927_v62 = vmul.f32 %v3923_v30, %v890_v17  ;;  %v483_v43 = vmul.f32 %v2891_v60, %v439_v23  ;;  %v482_v37 = vmul.f32 %v2888_v42, %v443_v48  ;;  %v3976_v60 = vld [vmem:[%s4184_s0 + $0x60] sm:$0xff] }
 0x11a   :  { %v563_v35 = vpop.permute.xlu1 %562  ;;  %v3935_v56 = vadd.f32 %v928_v54, %v3806_v3  ;;  %v386_v3 = vmul.f32 %v2876_v41, %v343_v33  ;;  %v403_v2 = vadd.f32 %v387_v19, %v4361_v39  ;;  %v528_v55 = vmul.f32 %v3976_v60, %v4351_v61  ;;  %v4362_v21 = vld [vmem:[#allocation10_spill] sm:$0xff]  ;;  %v3992_v61 = vld [vmem:[%s4184_s0 + $0x78] sm:$0xff] }
 0x11b   :  { %v555_v6 = vpop.permute.xlu0 %554  ;;  %v3943_v12 = vadd.f32 %v926_v15, %v3798_v24  ;;  %v3946_v13 = vadd.f32 %v927_v62, %v3808_v8  ;;  %v480_v24 = vmul.f32 %v2885_v58, %v451_v27  ;;  %v529_v58 = vmul.f32 %v3968_v50, %v2921_v63  ;;  %v4363_v63 = vld [vmem:[#allocation11_spill] sm:$0xff] }
 0x11c   :  { %1368 = vmatprep.mubr.f32.mxu1 %v3935_v56  ;;  %v591_v42 = vsel %vm339_vm7, %v555_v6, %v563_v35  ;;  %v402_v52 = vadd.f32 %v386_v3, %v4362_v21  ;;  %v499_v54 = vadd.f32 %v483_v43, %v403_v2  ;;  %v531_v17 = vmul.f32 %v3992_v61, %v2901_v14 }
 0x11d   :  { %1279 = vmatprep.mubr.f32.mxu0 %v3943_v12  ;;  %1369 = vmatmul.mubr.f32.gmra.mxu1 %v3946_v13  ;;  %v496_v46 = vadd.f32 %v480_v24, %v4363_v63  ;;  %v624_v62 = vmul.f32 %v2898_v49, %v591_v42  ;;  %v545_v27 = vadd.f32 %v529_v58, %v497_v40  ;;  %v4365_v24 = vld [vmem:[#allocation19_spill] sm:$0xff]  ;;  %v4367_v40 = vld [vmem:[#allocation21_spill] sm:$0xff] }
 0x11e   :  { %1280 = vmatmul.mubr.f32.gmra.mxu0 %v3955_v25  ;;  %v579_v8 = vpop.permute.xlu1 %578  ;;  %v498_v15 = vadd.f32 %v482_v37, %v402_v52  ;;  %v838_v14 = vmul.f32 %v4352_v5, %v4364_v11  ;;  %v837_v43 = vmul.f32 %v4355_v36, %v4365_v24  ;;  %v839_v5 = vmul.f32 %v4357_v38, %v4367_v40 }
 0x11f   :  { %v571_v41 = vpop.permute.xlu0 %570  ;;  %v595_v51 = vsel %vm339_vm7, %v579_v8, %v555_v6  ;;  %v544_v19 = vadd.f32 %v528_v55, %v496_v46  ;;  %v547_v37 = vadd.f32 %v531_v17, %v499_v54 }
 0x120   :  { %v587_v20 = vsel %vm339_vm7, %v563_v35, %v571_v41  ;;  %v583_v26 = vsel %vm339_vm7, %v571_v41, %v579_v8  ;;  %v627_v23 = vmul.f32 %v2904_v1, %v595_v51 }
 0x121   :  { %v625_v45 = vmul.f32 %v2960_v44, %v587_v20  ;;  %v4002_v44 = vld [vmem:[%s4184_s0 + $0x70] sm:$0xff]  ;;  %v626_v49 = vmul.f32 %v2965_v9, %v583_v26  ;;  %v640_v58 = vadd.f32 %v624_v62, %v544_v19 }
 0x122   :  { %v728_v18 = vpop.permute.xlu1 %727  ;;  %v530_v33 = vmul.f32 %v4002_v44, %v2924_v29  ;;  %v4366_v29 = vld [vmem:[#allocation20_spill] sm:$0xff]  ;;  %v643_v55 = vadd.f32 %v627_v23, %v547_v37 }
 0x123   :  { %v720_v35 = vpop.permute.xlu0 %719  ;;  %v641_v48 = vadd.f32 %v625_v45, %v545_v27  ;;  %v840_v8 = vmul.f32 %v4356_v22, %v4366_v29 }
 0x124   :  { %v756_v6 = vsel %vm194_vm6, %v720_v35, %v728_v18  ;;  %v546_v41 = vadd.f32 %v530_v33, %v498_v15 }
 0x125   :  { %v790_v3 = vmul.f32 %v3010_v28, %v756_v6 }
 0x126   :  { %v744_v1 = vpop.permute.xlu1 %743  ;;  %v642_v42 = vadd.f32 %v626_v49, %v546_v41  ;;  %v4370_v41 = vld [vmem:[#allocation30_spill] sm:$0xff] }
 0x127   :  { %v806_v39 = vadd.f32 %v790_v3, %v641_v48  ;;  %v760_v9 = vsel %vm194_vm6, %v744_v1, %v720_v35  ;;  %v736_v2 = vpop.permute.xlu0 %735 }
 0x128   :  { %v789_v28 = vmul.f32 %v3044_v57, %v760_v9  ;;  %v748_v36 = vsel %vm194_vm6, %v736_v2, %v744_v1  ;;  %v752_v22 = vsel %vm194_vm6, %v728_v18, %v736_v2 }
 0x129   :  { %v791_v38 = vmul.f32 %v3047_v16, %v752_v22  ;;  %v792_v20 = vmul.f32 %v3056_v47, %v748_v36  ;;  %v854_v21 = vadd.f32 %v838_v14, %v806_v39 }
 0x12a   :  { %v805_v52 = vadd.f32 %v789_v28, %v640_v58  ;;  %v870_v63 = vpop.permute.xlu1 %869 }
 0x12b   :  { %v807_v46 = vadd.f32 %v791_v38, %v642_v42  ;;  %v808_v51 = vadd.f32 %v792_v20, %v643_v55  ;;  %v862_v45 = vpop.permute.xlu0 %861 }
 0x12c   :  { %v853_v54 = vadd.f32 %v837_v43, %v805_v52  ;;  %v899_v57 = vsel %vm339_vm7, %v862_v45, %v870_v63 }
 0x12d   :  { %v856_v17 = vadd.f32 %v840_v8, %v808_v51  ;;  %v855_v26 = vadd.f32 %v839_v5, %v807_v46  ;;  %v929_v16 = vmul.f32 %v3897_v59, %v899_v57  ;;  %v1810_v46 = vld [vmem:[%s4184_s0] sm:$0xff] }
 0x12e   :  { %v886_v15 = vpop.permute.xlu1 %885 }
 0x12f   :  { %v903_v18 = vsel %vm339_vm7, %v886_v15, %v862_v45  ;;  %v878_v62 = vpop.permute.xlu0 %877  ;;  %v945_v48 = vadd.f32 %v929_v16, %v3880_v4 }
 0x130   :  { %v932_v47 = vmul.f32 %v3903_v7, %v903_v18  ;;  %v891_v33 = vsel %vm339_vm7, %v878_v62, %v886_v15  ;;  %v895_v27 = vsel %vm339_vm7, %v870_v63, %v878_v62 }
 0x131   :  { %v930_v35 = vmul.f32 %v3917_v32, %v895_v27  ;;  %v931_v11 = vmul.f32 %v3923_v30, %v891_v33 }
 0x132   :  { %v872_v14 = vpop.permute.xlu1 %871  ;;  %v948_v23 = vadd.f32 %v932_v47, %v3884_v34 }
 0x133   :  { %v864_v6 = vpop.permute.xlu0 %863  ;;  %v946_v19 = vadd.f32 %v930_v35, %v3878_v0  ;;  %v947_v49 = vadd.f32 %v931_v11, %v3886_v31 }
 0x134   :  { %1374 = vmatprep.mubr.f32.mxu1 %v948_v23  ;;  %v900_v3 = vsel %vm339_vm7, %v864_v6, %v872_v14 }
 0x135   :  { %1285 = vmatprep.mubr.f32.mxu0 %v946_v19  ;;  %1375 = vmatmul.mubr.f32.gmra.mxu1 %v947_v49  ;;  %v933_v34 = vmul.f32 %v3897_v59, %v900_v3  ;;  %v4368_v59 = vld [vmem:[#allocation29_spill] sm:$0xff] }
 0x136   :  { %1286 = vmatmul.mubr.f32.gmra.mxu0 %v945_v48  ;;  %v888_v24 = vpop.permute.xlu1 %887 }
 0x137   :  { %v904_v43 = vsel %vm339_vm7, %v888_v24, %v864_v6  ;;  %v880_v29 = vpop.permute.xlu0 %879  ;;  %v949_v58 = vadd.f32 %v933_v34, %v853_v54  ;;  %v1811_v54 = vld [vmem:[%s4184_s0 + $0x8] sm:$0xff] }
 0x138   :  { %v936_v0 = vmul.f32 %v3903_v7, %v904_v43  ;;  %v892_v31 = vsel %vm339_vm7, %v880_v29, %v888_v24  ;;  %v896_v4 = vsel %vm339_vm7, %v872_v14, %v880_v29  ;;  %v4369_v7 = vld [vmem:[#allocation28_spill] sm:$0xff] }
 0x139   :  { %v934_v8 = vmul.f32 %v3917_v32, %v896_v4  ;;  %v935_v40 = vmul.f32 %v3923_v30, %v892_v31 }
 0x13a   :  { %v952_v5 = vadd.f32 %v936_v0, %v856_v17 }
 0x13b   :  { %v950_v37 = vadd.f32 %v934_v8, %v854_v21  ;;  %v951_v1 = vadd.f32 %v935_v40, %v855_v26 }
 0x13c   :  { %1380 = vmatprep.mubr.f32.mxu1 %v952_v5 }
 0x13d   :  { %1291 = vmatprep.mubr.f32.mxu0 %v950_v37  ;;  %1381 = vmatmul.mubr.f32.gmra.mxu1 %v951_v1 }
 0x13e   :  { %1292 = vmatmul.mubr.f32.gmra.mxu0 %v949_v58  ;;  %1540 = vmatprep.mubr.f32.mxu1 %v4368_v59 }
 0x13f   :  { %1451 = vmatprep.mubr.f32.mxu0 %v4369_v7 }
 0x141   :  { %1541 = vmatmul.mubr.f32.vlgmr.msra.gmra.mxu1 %v4370_v41 }
 0x142   :  { %1452 = vmatmul.mubr.f32.vlgmr.msra.gmra.mxu0 %v4371_v53  ;;  %1546 = vmatprep.mubr.f32.mxu1 %v3935_v56 }
 0x143   :  { %1457 = vmatprep.mubr.f32.mxu0 %v3943_v12 }
 0x145   :  { %1547 = vmatmul.mubr.f32.gmra.mxu1 %v3946_v13 }
 0x146   :  { %1458 = vmatmul.mubr.f32.gmra.mxu0 %v3955_v25  ;;  %1552 = vmatprep.mubr.f32.mxu1 %v948_v23 }
 0x147   :  { %1463 = vmatprep.mubr.f32.mxu0 %v946_v19 }
 0x149   :  { %1553 = vmatmul.mubr.f32.gmra.mxu1 %v947_v49 }
 0x14a   :  { %1464 = vmatmul.mubr.f32.gmra.mxu0 %v945_v48  ;;  %1558 = vmatprep.mubr.f32.mxu1 %v952_v5 }
 0x14b   :  { %1469 = vmatprep.mubr.f32.mxu0 %v950_v37 }
 0x14d   :  { %1559 = vmatmul.mubr.f32.gmra.mxu1 %v951_v1 }
 0x14e   :  { %1470 = vmatmul.mubr.f32.gmra.mxu0 %v949_v58 }
 0x16e   :  { %v1275_v32 = vpop.f32.mrf.mxu0  ;;  %v1364_v30 = vpop.f32.mrf.mxu1 }
 0x16f   :  { %v1365_v39 = vadd.f32 %v1364_v30, %v1275_v32 }
 0x170   :  { %v1277_v9 = vpop.f32.mrf.mxu0  ;;  %v1366_v2 = vpop.f32.mrf.mxu1 }
 0x171   :  { %v1565_v56 = vsub.f32 0.0, %v1365_v39  ;;  %v1367_v55 = vadd.f32 %v1366_v2, %v1277_v9  ;;  %v1645_v38 = vmul.f32 0.1, %v1365_v39 }
 0x173   :  { %v1581_v12 = vmul.f32 1.442695, %v1565_v56  ;;  %v1566_v28 = vsub.f32 0.0, %v1367_v55  ;;  %v1646_v52 = vmul.f32 0.1, %v1367_v55 }
 0x175   :  { %1719 = vpow2.f32 %v1581_v12  ;;  %v1583_v13 = vmul.f32 1.442695, %v1566_v28  ;;  %v4372_v28 = vld [vmem:[#allocation12_spill] sm:$0xff] }
 0x177   :  { %1721 = vpow2.f32 %v1583_v13 }
 0x182   :  { %v1720_v25 = vpop.eup %1719 }
 0x183   :  { %v1613_v36 = vadd.f32 1.0, %v1720_v25 }
 0x184   :  { %v1722_v22 = vpop.eup %1721 }
 0x185   :  { %1723 = vrcp.f32 %v1613_v36  ;;  %v1614_v42 = vadd.f32 1.0, %v1722_v22 }
 0x187   :  { %1725 = vrcp.f32 %v1614_v42 }
 0x192   :  { %v1724_v20 = vpop.eup %1723 }
 0x193   :  { %v1661_v21 = vmul.f32 %v1724_v20, %v1645_v38 }
 0x194   :  { %v1726_v63 = vpop.eup %1725 }
 0x195   :  { %v1677_v51 = vadd.f32 %v1810_v46, %v1661_v21  ;;  %v1662_v45 = vmul.f32 %v1726_v63, %v1646_v52  ;;  %v4373_v21 = vld [vmem:[#allocation13_spill] sm:$0xff] }
 0x197   :  { %1693 = vst [vmem:[%s4187_s3] sm:$0xff] %v1677_v51  ;;  %v1678_v57 = vadd.f32 %v1811_v54, %v1662_v45 }
 0x199   :  { %1694 = vst [vmem:[%s4187_s3 + $0x8] sm:$0xff] %v1678_v57 }
 0x1dd   :  { %v1370_v17 = vpop.f32.mrf.mxu1 }
 0x1de   :  { %v1281_v26 = vpop.f32.mrf.mxu0 }
 0x1df   :  { %v1371_v15 = vadd.f32 %v1370_v17, %v1281_v26  ;;  %v1372_v18 = vpop.f32.mrf.mxu1 }
 0x1e0   :  { %v1283_v62 = vpop.f32.mrf.mxu0 }
 0x1e1   :  { %v1569_v16 = vsub.f32 0.0, %v1371_v15  ;;  %v1373_v47 = vadd.f32 %v1372_v18, %v1283_v62  ;;  %v1649_v1 = vmul.f32 0.1, %v1371_v15 }
 0x1e3   :  { %v1589_v33 = vmul.f32 1.442695, %v1569_v16  ;;  %v1570_v27 = vsub.f32 0.0, %v1373_v47  ;;  %v1650_v30 = vmul.f32 0.1, %v1373_v47 }
 0x1e5   :  { %1727 = vpow2.f32 %v1589_v33  ;;  %v1591_v35 = vmul.f32 1.442695, %v1570_v27 }
 0x1e7   :  { %1729 = vpow2.f32 %v1591_v35 }
 0x1f2   :  { %v1728_v11 = vpop.eup %1727 }
 0x1f3   :  { %v1617_v14 = vadd.f32 1.0, %v1728_v11 }
 0x1f4   :  { %v1730_v23 = vpop.eup %1729 }
 0x1f5   :  { %1731 = vrcp.f32 %v1617_v14  ;;  %v1618_v6 = vadd.f32 1.0, %v1730_v23  ;;  %v1376_v19 = vpop.f32.mrf.mxu1 }
 0x1f6   :  { %v1287_v49 = vpop.f32.mrf.mxu0 }
 0x1f7   :  { %1733 = vrcp.f32 %v1618_v6  ;;  %v4076_v48 = vadd.f32 %v1376_v19, %v1287_v49  ;;  %v1378_v3 = vpop.f32.mrf.mxu1 }
 0x1f8   :  { %v1289_v24 = vpop.f32.mrf.mxu0 }
 0x1f9   :  { %v1573_v43 = vsub.f32 0.0, %v4076_v48  ;;  %v4079_v29 = vadd.f32 %v1378_v3, %v1289_v24 }
 0x1fb   :  { %v1597_v34 = vmul.f32 1.442695, %v1573_v43  ;;  %v1574_v0 = vsub.f32 0.0, %v4079_v29 }
 0x1fd   :  { %1735 = vpow2.f32 %v1597_v34  ;;  %v1599_v31 = vmul.f32 1.442695, %v1574_v0  ;;  %v1382_v4 = vpop.f32.mrf.mxu1 }
 0x1fe   :  { %v1293_v8 = vpop.f32.mrf.mxu0 }
 0x1ff   :  { %1737 = vpow2.f32 %v1599_v31  ;;  %v4082_v40 = vadd.f32 %v1382_v4, %v1293_v8  ;;  %v1384_v5 = vpop.f32.mrf.mxu1 }
 0x200   :  { %v1295_v37 = vpop.f32.mrf.mxu0 }
 0x201   :  { %v1577_v58 = vsub.f32 0.0, %v4082_v40  ;;  %v4085_v59 = vadd.f32 %v1384_v5, %v1295_v37  ;;  %v1542_v7 = vpop.f32.mrf.mxu1 }
 0x202   :  { %v1732_v41 = vpop.eup %1731  ;;  %v1453_v53 = vpop.f32.mrf.mxu0 }
 0x203   :  { %v1665_v32 = vmul.f32 %v1732_v41, %v1649_v1  ;;  %v1605_v39 = vmul.f32 1.442695, %v1577_v58  ;;  %v1578_v9 = vsub.f32 0.0, %v4085_v59  ;;  %v1544_v2 = vpop.f32.mrf.mxu1  ;;  %v4088_v55 = vadd.f32 %v1542_v7, %v1453_v53 }
 0x204   :  { %v1734_v56 = vpop.eup %1733  ;;  %v1455_v12 = vpop.f32.mrf.mxu0 }
 0x205   :  { %v1681_v13 = vadd.f32 %v4372_v28, %v1665_v32  ;;  %v1666_v25 = vmul.f32 %v1734_v56, %v1650_v30  ;;  %1739 = vpow2.f32 %v1605_v39  ;;  %v1607_v36 = vmul.f32 1.442695, %v1578_v9  ;;  %v1548_v22 = vpop.f32.mrf.mxu1 }
 0x206   :  { %v1567_v42 = vsub.f32 0.0, %v4088_v55  ;;  %v4092_v38 = vadd.f32 %v1544_v2, %v1455_v12  ;;  %v1459_v20 = vpop.f32.mrf.mxu0  ;;  %v1653_v56 = vmul.f32 0.1, %v4076_v48  ;;  %v4374_v48 = vld [vmem:[#allocation23_spill] sm:$0xff] }
 0x207   :  { %1697 = vst [vmem:[%s4187_s3 + $0x20] sm:$0xff] %v1681_v13  ;;  %v1682_v52 = vadd.f32 %v4373_v21, %v1666_v25  ;;  %1741 = vpow2.f32 %v1607_v36  ;;  %v4098_v63 = vadd.f32 %v1548_v22, %v1459_v20  ;;  %v1550_v46 = vpop.f32.mrf.mxu1  ;;  %v1654_v36 = vmul.f32 0.1, %v4079_v29 }
 0x208   :  { %v1585_v51 = vmul.f32 1.442695, %v1567_v42  ;;  %v1568_v45 = vsub.f32 0.0, %v4092_v38  ;;  %v1461_v54 = vpop.f32.mrf.mxu0  ;;  %v1657_v29 = vmul.f32 0.1, %v4082_v40 }
 0x209   :  { %1698 = vst [vmem:[%s4187_s3 + $0x28] sm:$0xff] %v1682_v52  ;;  %v1571_v57 = vsub.f32 0.0, %v4098_v63  ;;  %v4105_v17 = vadd.f32 %v1550_v46, %v1461_v54  ;;  %v1554_v26 = vpop.f32.mrf.mxu1 }
 0x20a   :  { %v1736_v15 = vpop.eup %1735  ;;  %1743 = vpow2.f32 %v1585_v51  ;;  %v1587_v18 = vmul.f32 1.442695, %v1568_v45  ;;  %v1465_v62 = vpop.f32.mrf.mxu0 }
 0x20b   :  { %v1621_v16 = vadd.f32 1.0, %v1736_v15  ;;  %v1593_v47 = vmul.f32 1.442695, %v1571_v57  ;;  %v1572_v33 = vsub.f32 0.0, %v4105_v17  ;;  %v1556_v27 = vpop.f32.mrf.mxu1  ;;  %v4108_v11 = vadd.f32 %v1554_v26, %v1465_v62 }
 0x20c   :  { %v1738_v35 = vpop.eup %1737  ;;  %1745 = vpow2.f32 %v1587_v18  ;;  %v1467_v14 = vpop.f32.mrf.mxu0  ;;  %v1658_v62 = vmul.f32 0.1, %v4085_v59  ;;  %v1648_v59 = vmul.f32 0.1, %v4092_v38 }
 0x20d   :  { %1747 = vrcp.f32 %v1621_v16  ;;  %v1622_v23 = vadd.f32 1.0, %v1738_v35  ;;  %v1595_v6 = vmul.f32 1.442695, %v1572_v33  ;;  %v4110_v19 = vadd.f32 %v1556_v27, %v1467_v14  ;;  %v1560_v49 = vpop.f32.mrf.mxu1 }
 0x20e   :  { %1749 = vpow2.f32 %v1593_v47  ;;  %v1575_v3 = vsub.f32 0.0, %v4108_v11  ;;  %v1471_v24 = vpop.f32.mrf.mxu0  ;;  %v1647_v14 = vmul.f32 0.1, %v4088_v55 }
 0x20f   :  { %1751 = vrcp.f32 %v1622_v23  ;;  %v1576_v43 = vsub.f32 0.0, %v4110_v19  ;;  %v4114_v34 = vadd.f32 %v1560_v49, %v1471_v24  ;;  %v1562_v0 = vpop.f32.mrf.mxu1 }
 0x210   :  { %1753 = vpow2.f32 %v1595_v6  ;;  %v1601_v31 = vmul.f32 1.442695, %v1575_v3  ;;  %v1473_v4 = vpop.f32.mrf.mxu0 }
 0x211   :  { %v1603_v8 = vmul.f32 1.442695, %v1576_v43  ;;  %v1579_v5 = vsub.f32 0.0, %v4114_v34  ;;  %v4117_v37 = vadd.f32 %v1562_v0, %v1473_v4  ;;  %v1651_v43 = vmul.f32 0.1, %v4098_v63 }
 0x212   :  { %v1740_v1 = vpop.eup %1739  ;;  %1755 = vpow2.f32 %v1601_v31  ;;  %v1652_v4 = vmul.f32 0.1, %v4105_v17 }
 0x213   :  { %v1625_v58 = vadd.f32 1.0, %v1740_v1  ;;  %1757 = vpow2.f32 %v1603_v8  ;;  %v1609_v7 = vmul.f32 1.442695, %v1579_v5  ;;  %v1580_v41 = vsub.f32 0.0, %v4117_v37  ;;  %v4375_v5 = vld [vmem:[#allocation5_spill] sm:$0xff] }
 0x214   :  { %v1742_v53 = vpop.eup %1741 }
 0x215   :  { %1759 = vrcp.f32 %v1625_v58  ;;  %v1626_v32 = vadd.f32 1.0, %v1742_v53  ;;  %v1611_v30 = vmul.f32 1.442695, %v1580_v41  ;;  %v1655_v58 = vmul.f32 0.1, %v4108_v11 }
 0x216   :  { %1761 = vpow2.f32 %v1609_v7  ;;  %v1656_v41 = vmul.f32 0.1, %v4110_v19  ;;  %v1659_v11 = vmul.f32 0.1, %v4114_v34 }
 0x217   :  { %v1744_v39 = vpop.eup %1743  ;;  %1763 = vrcp.f32 %v1626_v32  ;;  %v4376_v32 = vld [vmem:[#allocation22_spill] sm:$0xff] }
 0x218   :  { %v1615_v9 = vadd.f32 1.0, %v1744_v39  ;;  %1765 = vpow2.f32 %v1611_v30 }
 0x219   :  { %v1746_v2 = vpop.eup %1745 }
 0x21a   :  { %v1748_v12 = vpop.eup %1747  ;;  %1767 = vrcp.f32 %v1615_v9  ;;  %v1616_v28 = vadd.f32 1.0, %v1746_v2  ;;  %v4377_v9 = vld [vmem:[#allocation24_spill] sm:$0xff] }
 0x21b   :  { %v1750_v13 = vpop.eup %1749  ;;  %v1669_v25 = vmul.f32 %v1748_v12, %v1653_v56  ;;  %v4378_v12 = vld [vmem:[#allocation3_spill] sm:$0xff] }
 0x21c   :  { %v1752_v22 = vpop.eup %1751  ;;  %1769 = vrcp.f32 %v1616_v28  ;;  %v1619_v42 = vadd.f32 1.0, %v1750_v13  ;;  %v1660_v13 = vmul.f32 0.1, %v4117_v37 }
 0x21d   :  { %v1754_v20 = vpop.eup %1753  ;;  %v1685_v21 = vadd.f32 %v3828_v10, %v1669_v25  ;;  %v1670_v52 = vmul.f32 %v1752_v22, %v1654_v36 }
 0x21e   :  { %1771 = vrcp.f32 %v1619_v42  ;;  %v1620_v46 = vadd.f32 1.0, %v1754_v20 }
 0x21f   :  { %v1756_v51 = vpop.eup %1755  ;;  %1701 = vst [vmem:[%s4187_s3 + $0x40] sm:$0xff] %v1685_v21  ;;  %v1686_v45 = vadd.f32 %v4374_v48, %v1670_v52 }
 0x220   :  { %v1758_v54 = vpop.eup %1757  ;;  %1773 = vrcp.f32 %v1620_v46  ;;  %v1623_v57 = vadd.f32 1.0, %v1756_v51 }
 0x221   :  { %1702 = vst [vmem:[%s4187_s3 + $0x48] sm:$0xff] %v1686_v45  ;;  %v1624_v10 = vadd.f32 1.0, %v1758_v54 }
 0x222   :  { %v1760_v26 = vpop.eup %1759  ;;  %1775 = vrcp.f32 %v1623_v57 }
 0x223   :  { %v1762_v15 = vpop.eup %1761  ;;  %v1673_v18 = vmul.f32 %v1760_v26, %v1657_v29  ;;  %1777 = vrcp.f32 %v1624_v10 }
 0x224   :  { %v1764_v16 = vpop.eup %1763  ;;  %v1627_v47 = vadd.f32 1.0, %v1762_v15 }
 0x225   :  { %v1766_v33 = vpop.eup %1765  ;;  %v1689_v27 = vadd.f32 %v3976_v60, %v1673_v18  ;;  %v1674_v35 = vmul.f32 %v1764_v16, %v1658_v62  ;;  %v1812_v60 = vld [vmem:[%s4184_s0 + $0x10] sm:$0xff] }
 0x226   :  { %1779 = vrcp.f32 %v1627_v47  ;;  %v1628_v23 = vadd.f32 1.0, %v1766_v33 }
 0x227   :  { %v1768_v6 = vpop.eup %1767  ;;  %1705 = vst [vmem:[%s4187_s3 + $0x60] sm:$0xff] %v1689_v27  ;;  %v1690_v40 = vadd.f32 %v3968_v50, %v1674_v35  ;;  %v1813_v50 = vld [vmem:[%s4184_s0 + $0x18] sm:$0xff] }
 0x228   :  { %v1663_v49 = vmul.f32 %v1768_v6, %v1647_v14  ;;  %1781 = vrcp.f32 %v1628_v23 }
 0x229   :  { %v1770_v3 = vpop.eup %1769  ;;  %1706 = vst [vmem:[%s4187_s3 + $0x68] sm:$0xff] %v1690_v40 }
 0x22a   :  { %v1679_v55 = vadd.f32 %v1812_v60, %v1663_v49  ;;  %v1664_v24 = vmul.f32 %v1770_v3, %v1648_v59 }
 0x22b   :  { %v1772_v0 = vpop.eup %1771 }
 0x22c   :  { %1695 = vst [vmem:[%s4187_s3 + $0x10] sm:$0xff] %v1679_v55  ;;  %v1680_v38 = vadd.f32 %v1813_v50, %v1664_v24  ;;  %v1667_v31 = vmul.f32 %v1772_v0, %v1651_v43 }
 0x22d   :  { %v1774_v8 = vpop.eup %1773 }
 0x22e   :  { %1696 = vst [vmem:[%s4187_s3 + $0x18] sm:$0xff] %v1680_v38  ;;  %v1683_v63 = vadd.f32 %v4375_v5, %v1667_v31  ;;  %v1668_v1 = vmul.f32 %v1774_v8, %v1652_v4 }
 0x22f   :  { %v1776_v7 = vpop.eup %1775 }
 0x230   :  { %v1778_v53 = vpop.eup %1777  ;;  %1699 = vst [vmem:[%s4187_s3 + $0x30] sm:$0xff] %v1683_v63  ;;  %v1684_v17 = vadd.f32 %v4376_v32, %v1668_v1  ;;  %v1671_v30 = vmul.f32 %v1776_v7, %v1655_v58 }
 0x231   :  { %v1672_v39 = vmul.f32 %v1778_v53, %v1656_v41 }
 0x232   :  { %1700 = vst [vmem:[%s4187_s3 + $0x38] sm:$0xff] %v1684_v17  ;;  %v1687_v2 = vadd.f32 %v4377_v9, %v1671_v30 }
 0x233   :  { %v1780_v56 = vpop.eup %1779  ;;  %v1688_v19 = vadd.f32 %v4378_v12, %v1672_v39 }
 0x234   :  { %1703 = vst [vmem:[%s4187_s3 + $0x50] sm:$0xff] %v1687_v2  ;;  %v1675_v28 = vmul.f32 %v1780_v56, %v1659_v11 }
 0x235   :  { %v1782_v25 = vpop.eup %1781  ;;  %1704 = vst [vmem:[%s4187_s3 + $0x58] sm:$0xff] %v1688_v19 }
 0x236   :  { %v1691_v36 = vadd.f32 %v4002_v44, %v1675_v28  ;;  %v1676_v22 = vmul.f32 %v1782_v25, %v1660_v13 }
 0x238   :  { %1707 = vst [vmem:[%s4187_s3 + $0x70] sm:$0xff] %v1691_v36  ;;  %v1692_v34 = vadd.f32 %v3992_v61, %v1676_v22 }
 0x23a   :  { %1708 = vst [vmem:[%s4187_s3 + $0x78] sm:$0xff] %v1692_v34 }

</bundles_post_ra>
